<compile_context>
chip_gen: v7x
topology: tpu7x:2x2x1
jax: 0.10.0
libtpu: 0.0.40
codegen_flags: <defaults>
</compile_context>

<pallas_src>
import math
from functools import partial

import jax
import jax.numpy as jnp
from jax import lax
from jax.experimental import pallas as pl
from jax.experimental.pallas import tpu as pltpu


# ----------------------------------------------------------------------------
# Fused deform + classify kernel
# ----------------------------------------------------------------------------
def _deform_classify_kernel(H, W, coords_ref, img_ref, w_ref, b_ref, out_ref):
    """One (batch-slab, dest-pixel-slab) grid step.

    coords_ref: (Bt, 2, Nt)   f32  normalized dest coords, ch0 = x, ch1 = y
    img_ref:    (Bt, C, HW)   bf16 source image, spatial dims flattened
    w_ref:      (C, Nt, NCp)  bf16 classifier weights for this dest slab
    b_ref:      (1, NCp)      f32  classifier bias (lane-padded)
    out_ref:    (Bt, 1, NCp)  f32  logits accumulator (revisited across slabs)
    """
    Bt, C, HW = img_ref.shape
    Nt = coords_ref.shape[2]
    NCp = out_ref.shape[2]

    # Initialize the resident logits block with the bias on the first slab.
    @pl.when(pl.program_id(1) == 0)
    def _init():
        out_ref[...] = jnp.broadcast_to(b_ref[...][None], out_ref.shape)

    # Flat source-pixel index plane, shared by every image in the slab
    # (hoisted out of the batch loop; built directly in (HW, Nt) layout).
    q = lax.broadcasted_iota(jnp.int32, (HW, Nt), 0)

    for bt in range(Bt):                    # static unroll over the batch slab
        gx = coords_ref[bt, 0:1, :]         # (1, Nt)
        gy = coords_ref[bt, 1:2, :]

        # align_corners=False un-normalization; clip guards the int32 cast for
        # wildly out-of-range flows (anything clipped is fully outside anyway).
        px = jnp.clip(((gx + 1.0) * W - 1.0) * 0.5, -2.0, W + 1.0)
        py = jnp.clip(((gy + 1.0) * H - 1.0) * 0.5, -2.0, H + 1.0)
        x0f = jnp.floor(px)
        y0f = jnp.floor(py)
        fx = px - x0f
        fy = py - y0f
        x0 = x0f.astype(jnp.int32)
        y0 = y0f.astype(jnp.int32)
        x1 = x0 + 1
        y1 = y0 + 1

        # zeros padding: out-of-range neighbours get zero weight.
        vx0 = (x0 >= 0) & (x0 < W)
        vx1 = (x1 >= 0) & (x1 < W)
        vy0 = (y0 >= 0) & (y0 < H)
        vy1 = (y1 >= 0) & (y1 < H)
        w00 = jnp.where(vy0 & vx0, (1.0 - fy) * (1.0 - fx), 0.0)   # (1, Nt)
        w01 = jnp.where(vy0 & vx1, (1.0 - fy) * fx, 0.0)
        w10 = jnp.where(vy1 & vx0, fy * (1.0 - fx), 0.0)
        w11 = jnp.where(vy1 & vx1, fy * fx, 0.0)

        q00 = y0 * W + x0                   # flat index of the NW neighbour

        # Sampling slab built in f32 on the VPU, directly in (src, dst) layout.
        S = (jnp.where(q == q00, w00, 0.0)
             + jnp.where(q == q00 + 1, w01, 0.0)
             + jnp.where(q == q00 + W, w10, 0.0)
             + jnp.where(q == q00 + W + 1, w11, 0.0))              # (HW, Nt)

        # Bilinear gather as one MXU matmul (bf16 operands, f32 accumulate).
        warped = jnp.dot(img_ref[bt], S.astype(jnp.bfloat16),
                         preferred_element_type=jnp.float32)       # (C, Nt) f32

        # Fused classifier epilogue: contract this dest slab against the
        # matching slice of the classifier weights; accumulate into out_ref.
        wb = warped.astype(jnp.bfloat16)
        acc = jnp.zeros((1, NCp), jnp.float32)
        for c in range(C):                  # C is tiny (<= a few channels)
            acc = acc + jnp.dot(wb[c:c + 1, :], w_ref[c],
                                preferred_element_type=jnp.float32)
        out_ref[bt] = out_ref[bt] + acc


def _classifier_kernel(x_ref, w_ref, b_ref, o_ref):
    # x: (Bp, D), w: (D, NCp), b: (1, NCp) -> o: (Bp, NCp)
    o_ref[...] = (jnp.dot(x_ref[...].astype(jnp.bfloat16),
                          w_ref[...].astype(jnp.bfloat16),
                          preferred_element_type=jnp.float32)
                  + b_ref[...])


# ----------------------------------------------------------------------------
# Wrappers
# ----------------------------------------------------------------------------
def _pick_block_b(B):
    # Biggest batch slab that still leaves >= 2 parallel grid steps (v7x 2 TCs).
    for bt in (8, 4, 2):
        if B % bt == 0 and B // bt >= 2:
            return bt
    return 1


def _pick_slab(HW):
    # Dest-pixel slab width: bound the (HW, Nt) f32 sampling slab to ~4 MiB.
    if HW <= 1024:
        return HW
    for nt in (1024, 512, 256, 128):
        if HW % nt == 0 and HW * nt * 4 <= 4 * 1024 * 1024:
            return nt
    return 128 if HW % 128 == 0 else HW


def deform_classify_pallas(img, coords, w_pad, b_pad, *, block_b=None, slab=None):
    """img: (B, C, H, W) f32;  coords: (B, 2, H*W) f32 (ch0=x, ch1=y);
    w_pad: (C*H*W, NCp) f32;  b_pad: (NCp,) f32.  Returns (B, NCp) f32 logits."""
    B, C, H, W = img.shape
    HW = H * W
    D, NCp = w_pad.shape
    assert D == C * HW and NCp % 128 == 0

    Bt = block_b or _pick_block_b(B)
    Nt = slab or _pick_slab(HW)
    assert B % Bt == 0 and HW % Nt == 0

    img_flat = img.reshape(B, C, HW).astype(jnp.bfloat16)
    w3 = w_pad.reshape(C, HW, NCp).astype(jnp.bfloat16)
    b2 = b_pad.reshape(1, NCp).astype(jnp.float32)

    out = pl.pallas_call(
        partial(_deform_classify_kernel, H, W),
        out_shape=jax.ShapeDtypeStruct((B, 1, NCp), jnp.float32),
        grid=(B // Bt, HW // Nt),
        in_specs=[
            pl.BlockSpec((Bt, 2, Nt), lambda i, j: (i, 0, j)),    # coords slab
            pl.BlockSpec((Bt, C, HW), lambda i, j: (i, 0, 0)),    # full image
            pl.BlockSpec((C, Nt, NCp), lambda i, j: (0, j, 0)),   # weight slab
            pl.BlockSpec((1, NCp), lambda i, j: (0, 0)),          # bias
        ],
        out_specs=pl.BlockSpec((Bt, 1, NCp), lambda i, j: (i, 0, 0)),
        compiler_params=pltpu.CompilerParams(
            dimension_semantics=("parallel", "arbitrary"),
            vmem_limit_bytes=32 * 1024 * 1024),
    )(coords, img_flat, w3, b2)
    return out.reshape(B, NCp)


def linear_classifier_pallas(x_flat, w_pad, b_pad):
    """Standalone classifier (nominal / pixel_perturbations paths)."""
    # TODO(synk): tile over K with a VMEM accumulator for realistic feature dims.
    B, _ = x_flat.shape
    NCp = w_pad.shape[1]
    Bp = ((B + 7) // 8) * 8                          # dense sublane stores
    if Bp != B:
        x_flat = jnp.pad(x_flat, ((0, Bp - B), (0, 0)))
    out = pl.pallas_call(
        _classifier_kernel,
        out_shape=jax.ShapeDtypeStruct((Bp, NCp), jnp.float32),
    )(x_flat, w_pad, b_pad.reshape(1, NCp))
    return out[:B]


# ----------------------------------------------------------------------------
# DeformWrapper (JAX / Pallas)
# ----------------------------------------------------------------------------
class DeformWrapperPallas:
    def __init__(self, cls_w, cls_b, aug_method, sigma=0.1, num_bases=2):
        self.aug_method = aug_method
        self.sigma = sigma * math.pi if aug_method == "rotation" else sigma
        self.num_bases = num_bases
        self.num_classes = cls_w.shape[1]
        ncp = ((self.num_classes + 127) // 128) * 128      # lane-dense output
        self.ncp = ncp
        self.cls_w_pad = jnp.pad(cls_w.astype(jnp.float32),
                                 ((0, 0), (0, ncp - self.num_classes)))
        self.cls_b_pad = jnp.pad(cls_b.astype(jnp.float32),
                                 (0, ncp - self.num_classes))

    # --- flow builders: plain-JAX glue, emit coords directly in (B, 2, HW) ---
    @staticmethod
    def _mesh(H, W):
        lin_r = jnp.linspace(-1.0, 1.0, H)
        lin_c = jnp.linspace(-1.0, 1.0, W)
        X = jnp.broadcast_to(lin_r[:, None], (H, W))   # torch.meshgrid 'ij' (rows)
        Y = jnp.broadcast_to(lin_c[None, :], (H, W))   # (cols)
        return X, Y

    @staticmethod
    def _pack(xc, yc, B, HW):
        return jnp.stack([xc.reshape(B, HW), yc.reshape(B, HW)], axis=1)

    def _rotation_coords(self, key, B, H, W):
        X, Y = self._mesh(H, W)
        ang = (-2.0 * jax.random.uniform(key, (B, 1, 1)) + 1.0) * self.sigma
        ca, sa = jnp.cos(ang), jnp.sin(ang)
        Xv = X[None] * ca - Y[None] * sa - X[None]
        Yv = X[None] * sa + Y[None] * ca - Y[None]
        return self._pack(Y[None] + Yv, X[None] + Xv, B, H * W)

    def _translation_coords(self, key, B, H, W):
        X, Y = self._mesh(H, W)
        kx, ky = jax.random.split(key)
        Xv = jnp.broadcast_to(jax.random.normal(kx, (B, 1, 1)) * self.sigma, (B, H, W))
        Yv = jnp.broadcast_to(jax.random.normal(ky, (B, 1, 1)) * self.sigma, (B, H, W))
        return self._pack(Y[None] + Yv, X[None] + Xv, B, H * W)

    def _scaling_coords(self, key, B, H, W):
        X, Y = self._mesh(H, W)
        scale = (-2.0 * jax.random.uniform(key, (B, 1, 1)) + 1.0) * self.sigma + 1.0
        Xv = X[None] * scale - X[None]
        Yv = Y[None] * scale - Y[None]
        return self._pack(Y[None] + Yv, X[None] + Xv, B, H * W)

    def _affine_coords(self, key, B, H, W):
        X, Y = self._mesh(H, W)
        p = jax.random.normal(key, (6, B, 1, 1)) * self.sigma
        Xv = p[0] * X[None] + p[1] * Y[None] + p[2]
        Yv = p[3] * X[None] + p[4] * Y[None] + p[5]
        return self._pack(Y[None] + Yv, X[None] + Xv, B, H * W)

    def _gaussian_full_coords(self, key, B, H, W):
        X, Y = self._mesh(H, W)
        flow = jax.random.normal(key, (B, 2, H, W)) * self.sigma
        return self._pack(Y[None] + flow[:, 0], X[None] + flow[:, 1], B, H * W)

    def _dct_coords(self, key, B, H, W):
        X, Y = self._mesh(H, W)
        nb = self.num_bases
        Xr = X.reshape(1, 1, 1, H, W)
        Yr = Y.reshape(1, 1, 1, H, W)
        param_ab = jax.random.normal(key, (B, nb, nb, 1, 2)) * self.sigma
        a = param_ab[:, :, :, :, 0][..., None]         # (B, nb, nb, 1, 1)
        b = param_ab[:, :, :, :, 1][..., None]
        K1 = jnp.arange(nb).reshape(1, nb, 1, 1, 1)
        K2 = jnp.arange(nb).reshape(1, 1, nb, 1, 1)
        basis = (jnp.cos(math.pi * (K1 * (Xr + 0.5 / H)))
                 * jnp.cos(math.pi * (K2 * (Yr + 0.5 / W))))   # (1, nb, nb, H, W)
        U = jnp.sum(a * basis, axis=(1, 2))[:, 0]      # (B, H, W) (no squeeze-B bug)
        V = jnp.sum(b * basis, axis=(1, 2))[:, 0]
        return self._pack(Y[None] + V, X[None] + U, B, H * W)

    def _coords(self, method, key, B, H, W):
        if method == "gaussianFull":
            return self._gaussian_full_coords(key, B, H, W)
        if method == "rotation":
            return self._rotation_coords(key, B, H, W)
        if method == "translation":
            return self._translation_coords(key, B, H, W)
        if method == "affine":
            return self._affine_coords(key, B, H, W)
        if method == "scaling_uniform":
            return self._scaling_coords(key, B, H, W)
        if method == "DCT":
            return self._dct_coords(key, B, H, W)
        raise Exception("Un identified augmentation method!")

    # --- forward -------------------------------------------------------------
    def _classify(self, x):
        B = x.shape[0]
        logits = linear_classifier_pallas(x.reshape(B, -1),
                                          self.cls_w_pad, self.cls_b_pad)
        return logits[:, :self.num_classes]

    def __call__(self, x, key):
        B, C, H, W = x.shape
        m = self.aug_method
        if m == "nominal":
            return self._classify(x)
        if m == "pixel_perturbations":
            noise = jax.random.normal(key, x.shape, x.dtype) * self.sigma
            return self._classify(x + noise)
        coords = self._coords(m, key, B, H, W)                   # (B, 2, HW)
        logits = deform_classify_pallas(x, coords, self.cls_w_pad, self.cls_b_pad)
        return logits[:, :self.num_classes]


# ----------------------------------------------------------------------------
# Pure-JAX reference: grid_sample (bilinear, zeros padding, align_corners=False)
# coords layout: (B, 2, H*W), ch0 = x, ch1 = y
# ----------------------------------------------------------------------------
def grid_sample_ref(img, coords):
    B, C, H, W = img.shape
    gx = coords[:, 0, :].reshape(B, H, W)
    gy = coords[:, 1, :].reshape(B, H, W)
    px = ((gx + 1.0) * W - 1.0) * 0.5
    py = ((gy + 1.0) * H - 1.0) * 0.5
    x0 = jnp.floor(px)
    y0 = jnp.floor(py)
    fx = px - x0
    fy = py - y0

    def gather(ix, iy, w):
        valid = (ix >= 0) & (ix < W) & (iy >= 0) & (iy < H)
        ixc = jnp.clip(ix, 0, W - 1).astype(jnp.int32)
        iyc = jnp.clip(iy, 0, H - 1).astype(jnp.int32)
        b_idx = jnp.arange(B)[:, None, None, None]
        c_idx = jnp.arange(C)[None, :, None, None]
        v = img[b_idx, c_idx, iyc[:, None, :, :], ixc[:, None, :, :]]
        return v * (w * valid)[:, None, :, :]

    return (gather(x0, y0, (1 - fx) * (1 - fy))
            + gather(x0 + 1, y0, fx * (1 - fy))
            + gather(x0, y0 + 1, (1 - fx) * fy)
            + gather(x0 + 1, y0 + 1, fx * fy))


# ----------------------------------------------------------------------------
if __name__ == "__main__":
    key = jax.random.PRNGKey(0)
    B, C, H, W = 2, 4, 16, 16
    NUM_CLASSES = 10

    k_img, k_w, k_rot, k_gau = jax.random.split(key, 4)
    x = jax.random.normal(k_img, (B, C, H, W), jnp.float32)
    cls_w = jax.random.normal(k_w, (C * H * W, NUM_CLASSES), jnp.float32) * 0.02
    cls_b = jnp.zeros((NUM_CLASSES,), jnp.float32)

    # rotation path (fused deform + classify kernel)
    model_rot = DeformWrapperPallas(cls_w, cls_b, aug_method="rotation", sigma=0.1)
    logits_rot = model_rot(x, k_rot)
    jax.block_until_ready(logits_rot)

    coords_rot = model_rot._rotation_coords(k_rot, B, H, W)
    ref_rot = grid_sample_ref(x, coords_rot).reshape(B, -1) @ cls_w + cls_b
    assert jnp.allclose(logits_rot, ref_rot, atol=5e-2, rtol=5e-2), "rotation mismatch"

    # gaussianFull path
    model_gau = DeformWrapperPallas(cls_w, cls_b, aug_method="gaussianFull", sigma=0.1)
    logits_gau = model_gau(x, k_gau)
    coords_gau = model_gau._gaussian_full_coords(k_gau, B, H, W)
    ref_gau = grid_sample_ref(x, coords_gau).reshape(B, -1) @ cls_w + cls_b
    assert jnp.allclose(logits_gau, ref_gau, atol=5e-2, rtol=5e-2), "gaussianFull mismatch"

    # nominal path (classifier-only kernel, padded lanes)
    model_nom = DeformWrapperPallas(cls_w, cls_b, aug_method="nominal", sigma=0.1)
    logits_nom = model_nom(x, k_rot)
    ref_nom = x.reshape(B, -1) @ cls_w + cls_b
    assert jnp.allclose(logits_nom, ref_nom, atol=5e-2, rtol=5e-2), "nominal mismatch"

    jax.block_until_ready((logits_rot, logits_gau, logits_nom))
    print("KERNEL_OK")
</pallas_src>

<mosaic_0001>
module attributes {stable_mosaic.version = 11 : i64} {
  func.func @_deform_classify_kernel(%arg0: i32, %arg1: i32, %arg2: memref<1x2x256xf32, #tpu.memory_space<vmem>>, %arg3: memref<1x4x256xbf16, #tpu.memory_space<vmem>>, %arg4: memref<4x256x128xbf16, #tpu.memory_space<vmem>>, %arg5: memref<1x128xf32, #tpu.memory_space<vmem>>, %arg6: memref<1x1x128xf32, #tpu.memory_space<vmem>>) attributes {dimension_semantics = [#tpu.dimension_semantics<parallel>, #tpu.dimension_semantics<arbitrary>], iteration_bounds = array<i64: 2, 1>, scalar_prefetch = 0 : i64, scratch_operands = 0 : i64, tpu.core_type = #tpu.core_type<tc>, window_params = [{transform_indices = @transform_0, window_bounds = array<i64: 1, 2, 256>}, {transform_indices = @transform_1, window_bounds = array<i64: 1, 4, 256>}, {transform_indices = @transform_2, window_bounds = array<i64: 4, 256, 128>}, {pipeline_mode = #tpu.pipeline_mode<synchronous>, transform_indices = @transform_3, window_bounds = array<i64: 1, 128>}, {transform_indices = @transform_4, window_bounds = array<i64: 1, 1, 128>}]} {
    %c0_i32 = arith.constant 0 : i32
    %0 = arith.cmpi eq, %arg1, %c0_i32 : i32
    %1 = arith.extui %0 : i1 to i32
    %c0_i32_0 = arith.constant 0 : i32
    %2 = arith.cmpi ne, %1, %c0_i32_0 : i32
    scf.if %2 {
      %c0_66 = arith.constant 0 : index
      %c0_67 = arith.constant 0 : index
      %156 = vector.load %arg5[%c0_66, %c0_67] : memref<1x128xf32, #tpu.memory_space<vmem>>, vector<1x128xf32>
      %157 = vector.shape_cast %156 : vector<1x128xf32> to vector<1x1x128xf32>
      %c0_68 = arith.constant 0 : index
      %c0_69 = arith.constant 0 : index
      %c0_70 = arith.constant 0 : index
      %158 = vector.load %arg6[%c0_68, %c0_69, %c0_70] : memref<1x1x128xf32, #tpu.memory_space<vmem>>, vector<1x1x128xf32>
      tpu.vector_store %arg6[%c0_68, %c0_69, %c0_70], %157 {strides = array<i32>} : memref<1x1x128xf32, #tpu.memory_space<vmem>>, vector<1x1x128xf32>,
    } else {
    }
    %3 = tpu.iota {dimensions = array<i32: 0>} : vector<256x256xi32>
    %c0 = arith.constant 0 : index
    %c0_1 = arith.constant 0 : index
    %c0_2 = arith.constant 0 : index
    %4 = vector.load %arg2[%c0, %c0_1, %c0_2] : memref<1x2x256xf32, #tpu.memory_space<vmem>>, vector<1x1x256xf32>
    %5 = vector.shape_cast %4 : vector<1x1x256xf32> to vector<1x256xf32>
    %c0_3 = arith.constant 0 : index
    %c1 = arith.constant 1 : index
    %c0_4 = arith.constant 0 : index
    %6 = vector.load %arg2[%c0_3, %c1, %c0_4] : memref<1x2x256xf32, #tpu.memory_space<vmem>>, vector<1x1x256xf32>
    %7 = vector.shape_cast %6 : vector<1x1x256xf32> to vector<1x256xf32>
    %cst = arith.constant 1.000000e+00 : f32
    %8 = vector.broadcast %cst : f32 to vector<1x256xf32>
    %9 = arith.addf %5, %8 : vector<1x256xf32>
    %cst_5 = arith.constant 1.600000e+01 : f32
    %10 = vector.broadcast %cst_5 : f32 to vector<1x256xf32>
    %11 = arith.mulf %9, %10 : vector<1x256xf32>
    %cst_6 = arith.constant 1.000000e+00 : f32
    %12 = vector.broadcast %cst_6 : f32 to vector<1x256xf32>
    %13 = arith.subf %11, %12 : vector<1x256xf32>
    %cst_7 = arith.constant 5.000000e-01 : f32
    %14 = vector.broadcast %cst_7 : f32 to vector<1x256xf32>
    %15 = arith.mulf %13, %14 : vector<1x256xf32>
    %cst_8 = arith.constant -2.000000e+00 : f32
    %cst_9 = arith.constant 1.700000e+01 : f32
    %16 = vector.broadcast %cst_8 : f32 to vector<1x256xf32>
    %17 = arith.maximumf %16, %15 : vector<1x256xf32>
    %18 = vector.broadcast %cst_9 : f32 to vector<1x256xf32>
    %19 = arith.minimumf %18, %17 : vector<1x256xf32>
    %cst_10 = arith.constant 1.000000e+00 : f32
    %20 = vector.broadcast %cst_10 : f32 to vector<1x256xf32>
    %21 = arith.addf %7, %20 : vector<1x256xf32>
    %cst_11 = arith.constant 1.600000e+01 : f32
    %22 = vector.broadcast %cst_11 : f32 to vector<1x256xf32>
    %23 = arith.mulf %21, %22 : vector<1x256xf32>
    %cst_12 = arith.constant 1.000000e+00 : f32
    %24 = vector.broadcast %cst_12 : f32 to vector<1x256xf32>
    %25 = arith.subf %23, %24 : vector<1x256xf32>
    %cst_13 = arith.constant 5.000000e-01 : f32
    %26 = vector.broadcast %cst_13 : f32 to vector<1x256xf32>
    %27 = arith.mulf %25, %26 : vector<1x256xf32>
    %cst_14 = arith.constant -2.000000e+00 : f32
    %cst_15 = arith.constant 1.700000e+01 : f32
    %28 = vector.broadcast %cst_14 : f32 to vector<1x256xf32>
    %29 = arith.maximumf %28, %27 : vector<1x256xf32>
    %30 = vector.broadcast %cst_15 : f32 to vector<1x256xf32>
    %31 = arith.minimumf %30, %29 : vector<1x256xf32>
    %32 = math.floor %19 : vector<1x256xf32>
    %33 = math.floor %31 : vector<1x256xf32>
    %34 = arith.subf %19, %32 : vector<1x256xf32>
    %35 = arith.subf %31, %33 : vector<1x256xf32>
    %36 = arith.fptosi %32 : vector<1x256xf32> to vector<1x256xi32>
    %37 = arith.fptosi %33 : vector<1x256xf32> to vector<1x256xi32>
    %c1_i32 = arith.constant 1 : i32
    %38 = vector.broadcast %c1_i32 : i32 to vector<1x256xi32>
    %39 = arith.addi %36, %38 : vector<1x256xi32>
    %c1_i32_16 = arith.constant 1 : i32
    %40 = vector.broadcast %c1_i32_16 : i32 to vector<1x256xi32>
    %41 = arith.addi %37, %40 : vector<1x256xi32>
    %c0_i32_17 = arith.constant 0 : i32
    %42 = vector.broadcast %c0_i32_17 : i32 to vector<1x256xi32>
    %43 = arith.cmpi sge, %36, %42 : vector<1x256xi32>
    %c16_i32 = arith.constant 16 : i32
    %44 = vector.broadcast %c16_i32 : i32 to vector<1x256xi32>
    %45 = arith.cmpi slt, %36, %44 : vector<1x256xi32>
    %46 = arith.andi %43, %45 : vector<1x256xi1>
    %c0_i32_18 = arith.constant 0 : i32
    %47 = vector.broadcast %c0_i32_18 : i32 to vector<1x256xi32>
    %48 = arith.cmpi sge, %39, %47 : vector<1x256xi32>
    %c16_i32_19 = arith.constant 16 : i32
    %49 = vector.broadcast %c16_i32_19 : i32 to vector<1x256xi32>
    %50 = arith.cmpi slt, %39, %49 : vector<1x256xi32>
    %51 = arith.andi %48, %50 : vector<1x256xi1>
    %c0_i32_20 = arith.constant 0 : i32
    %52 = vector.broadcast %c0_i32_20 : i32 to vector<1x256xi32>
    %53 = arith.cmpi sge, %37, %52 : vector<1x256xi32>
    %c16_i32_21 = arith.constant 16 : i32
    %54 = vector.broadcast %c16_i32_21 : i32 to vector<1x256xi32>
    %55 = arith.cmpi slt, %37, %54 : vector<1x256xi32>
    %56 = arith.andi %53, %55 : vector<1x256xi1>
    %c0_i32_22 = arith.constant 0 : i32
    %57 = vector.broadcast %c0_i32_22 : i32 to vector<1x256xi32>
    %58 = arith.cmpi sge, %41, %57 : vector<1x256xi32>
    %c16_i32_23 = arith.constant 16 : i32
    %59 = vector.broadcast %c16_i32_23 : i32 to vector<1x256xi32>
    %60 = arith.cmpi slt, %41, %59 : vector<1x256xi32>
    %61 = arith.andi %58, %60 : vector<1x256xi1>
    %62 = arith.andi %56, %46 : vector<1x256xi1>
    %cst_24 = arith.constant 1.000000e+00 : f32
    %63 = vector.broadcast %cst_24 : f32 to vector<1x256xf32>
    %64 = arith.subf %63, %35 : vector<1x256xf32>
    %cst_25 = arith.constant 1.000000e+00 : f32
    %65 = vector.broadcast %cst_25 : f32 to vector<1x256xf32>
    %66 = arith.subf %65, %34 : vector<1x256xf32>
    %67 = arith.mulf %64, %66 : vector<1x256xf32>
    %cst_26 = arith.constant 0.000000e+00 : f32
    %68 = vector.broadcast %cst_26 : f32 to vector<1x256xf32>
    %69 = arith.select %62, %67, %68 : vector<1x256xi1>, vector<1x256xf32>
    %70 = arith.andi %56, %51 : vector<1x256xi1>
    %cst_27 = arith.constant 1.000000e+00 : f32
    %71 = vector.broadcast %cst_27 : f32 to vector<1x256xf32>
    %72 = arith.subf %71, %35 : vector<1x256xf32>
    %73 = arith.mulf %72, %34 : vector<1x256xf32>
    %cst_28 = arith.constant 0.000000e+00 : f32
    %74 = vector.broadcast %cst_28 : f32 to vector<1x256xf32>
    %75 = arith.select %70, %73, %74 : vector<1x256xi1>, vector<1x256xf32>
    %76 = arith.andi %61, %46 : vector<1x256xi1>
    %cst_29 = arith.constant 1.000000e+00 : f32
    %77 = vector.broadcast %cst_29 : f32 to vector<1x256xf32>
    %78 = arith.subf %77, %34 : vector<1x256xf32>
    %79 = arith.mulf %35, %78 : vector<1x256xf32>
    %cst_30 = arith.constant 0.000000e+00 : f32
    %80 = vector.broadcast %cst_30 : f32 to vector<1x256xf32>
    %81 = arith.select %76, %79, %80 : vector<1x256xi1>, vector<1x256xf32>
    %82 = arith.andi %61, %51 : vector<1x256xi1>
    %83 = arith.mulf %35, %34 : vector<1x256xf32>
    %cst_31 = arith.constant 0.000000e+00 : f32
    %84 = vector.broadcast %cst_31 : f32 to vector<1x256xf32>
    %85 = arith.select %82, %83, %84 : vector<1x256xi1>, vector<1x256xf32>
    %c16_i32_32 = arith.constant 16 : i32
    %86 = vector.broadcast %c16_i32_32 : i32 to vector<1x256xi32>
    %87 = arith.muli %37, %86 : vector<1x256xi32>
    %88 = arith.addi %87, %36 : vector<1x256xi32>
    %89 = vector.broadcast %88 : vector<1x256xi32> to vector<256x256xi32>
    %90 = arith.cmpi eq, %3, %89 : vector<256x256xi32>
    %cst_33 = arith.constant 0.000000e+00 : f32
    %91 = vector.shape_cast %69 : vector<1x256xf32> to vector<1x256xf32>
    %92 = vector.broadcast %91 : vector<1x256xf32> to vector<256x256xf32>
    %93 = vector.broadcast %cst_33 : f32 to vector<256x256xf32>
    %94 = arith.select %90, %92, %93 : vector<256x256xi1>, vector<256x256xf32>
    %c1_i32_34 = arith.constant 1 : i32
    %95 = vector.broadcast %c1_i32_34 : i32 to vector<1x256xi32>
    %96 = arith.addi %88, %95 : vector<1x256xi32>
    %97 = vector.broadcast %96 : vector<1x256xi32> to vector<256x256xi32>
    %98 = arith.cmpi eq, %3, %97 : vector<256x256xi32>
    %cst_35 = arith.constant 0.000000e+00 : f32
    %99 = vector.shape_cast %75 : vector<1x256xf32> to vector<1x256xf32>
    %100 = vector.broadcast %99 : vector<1x256xf32> to vector<256x256xf32>
    %101 = vector.broadcast %cst_35 : f32 to vector<256x256xf32>
    %102 = arith.select %98, %100, %101 : vector<256x256xi1>, vector<256x256xf32>
    %103 = arith.addf %94, %102 : vector<256x256xf32>
    %c16_i32_36 = arith.constant 16 : i32
    %104 = vector.broadcast %c16_i32_36 : i32 to vector<1x256xi32>
    %105 = arith.addi %88, %104 : vector<1x256xi32>
    %106 = vector.broadcast %105 : vector<1x256xi32> to vector<256x256xi32>
    %107 = arith.cmpi eq, %3, %106 : vector<256x256xi32>
    %cst_37 = arith.constant 0.000000e+00 : f32
    %108 = vector.shape_cast %81 : vector<1x256xf32> to vector<1x256xf32>
    %109 = vector.broadcast %108 : vector<1x256xf32> to vector<256x256xf32>
    %110 = vector.broadcast %cst_37 : f32 to vector<256x256xf32>
    %111 = arith.select %107, %109, %110 : vector<256x256xi1>, vector<256x256xf32>
    %112 = arith.addf %103, %111 : vector<256x256xf32>
    %c16_i32_38 = arith.constant 16 : i32
    %113 = vector.broadcast %c16_i32_38 : i32 to vector<1x256xi32>
    %114 = arith.addi %88, %113 : vector<1x256xi32>
    %c1_i32_39 = arith.constant 1 : i32
    %115 = vector.broadcast %c1_i32_39 : i32 to vector<1x256xi32>
    %116 = arith.addi %114, %115 : vector<1x256xi32>
    %117 = vector.broadcast %116 : vector<1x256xi32> to vector<256x256xi32>
    %118 = arith.cmpi eq, %3, %117 : vector<256x256xi32>
    %cst_40 = arith.constant 0.000000e+00 : f32
    %119 = vector.shape_cast %85 : vector<1x256xf32> to vector<1x256xf32>
    %120 = vector.broadcast %119 : vector<1x256xf32> to vector<256x256xf32>
    %121 = vector.broadcast %cst_40 : f32 to vector<256x256xf32>
    %122 = arith.select %118, %120, %121 : vector<256x256xi1>, vector<256x256xf32>
    %123 = arith.addf %112, %122 : vector<256x256xf32>
    %c0_41 = arith.constant 0 : index
    %c0_42 = arith.constant 0 : index
    %c0_43 = arith.constant 0 : index
    %124 = vector.load %arg3[%c0_41, %c0_42, %c0_43] : memref<1x4x256xbf16, #tpu.memory_space<vmem>>, vector<1x4x256xbf16>
    %125 = vector.shape_cast %124 : vector<1x4x256xbf16> to vector<4x256xbf16>
    %126 = arith.truncf %123 : vector<256x256xf32> to vector<256x256xbf16>
    %cst_44 = arith.constant dense<0.000000e+00> : vector<4x256xf32>
    %127 = tpu.matmul %125, %126, %cst_44 {dimension_numbers = #tpu.dot_dimension_numbers<[1], [0], [0], [1], [0, 0, 1, 1], [], []>} : vector<4x256xbf16>, vector<256x256xbf16>, vector<4x256xf32> -> vector<4x256xf32>
    %128 = arith.truncf %127 : vector<4x256xf32> to vector<4x256xbf16>
    %cst_45 = arith.constant 0.000000e+00 : f32
    %129 = vector.broadcast %cst_45 : f32 to vector<1x128xf32>
    %130 = vector.extract_strided_slice %128 {offsets = [0, 0], sizes = [1, 256], strides = [1, 1]} : vector<4x256xbf16> to vector<1x256xbf16>
    %c0_46 = arith.constant 0 : index
    %c0_47 = arith.constant 0 : index
    %c0_48 = arith.constant 0 : index
    %131 = vector.load %arg4[%c0_46, %c0_47, %c0_48] : memref<4x256x128xbf16, #tpu.memory_space<vmem>>, vector<1x256x128xbf16>
    %132 = vector.shape_cast %131 : vector<1x256x128xbf16> to vector<256x128xbf16>
    %cst_49 = arith.constant dense<0.000000e+00> : vector<1x128xf32>
    %133 = tpu.matmul %130, %132, %cst_49 {dimension_numbers = #tpu.dot_dimension_numbers<[1], [0], [0], [1], [0, 0, 1, 1], [], []>} : vector<1x256xbf16>, vector<256x128xbf16>, vector<1x128xf32> -> vector<1x128xf32>
    %134 = arith.addf %129, %133 : vector<1x128xf32>
    %135 = vector.extract_strided_slice %128 {offsets = [1, 0], sizes = [1, 256], strides = [1, 1]} : vector<4x256xbf16> to vector<1x256xbf16>
    %c1_50 = arith.constant 1 : index
    %c0_51 = arith.constant 0 : index
    %c0_52 = arith.constant 0 : index
    %136 = vector.load %arg4[%c1_50, %c0_51, %c0_52] : memref<4x256x128xbf16, #tpu.memory_space<vmem>>, vector<1x256x128xbf16>
    %137 = vector.shape_cast %136 : vector<1x256x128xbf16> to vector<256x128xbf16>
    %cst_53 = arith.constant dense<0.000000e+00> : vector<1x128xf32>
    %138 = tpu.matmul %135, %137, %cst_53 {dimension_numbers = #tpu.dot_dimension_numbers<[1], [0], [0], [1], [0, 0, 1, 1], [], []>} : vector<1x256xbf16>, vector<256x128xbf16>, vector<1x128xf32> -> vector<1x128xf32>
    %139 = arith.addf %134, %138 : vector<1x128xf32>
    %140 = vector.extract_strided_slice %128 {offsets = [2, 0], sizes = [1, 256], strides = [1, 1]} : vector<4x256xbf16> to vector<1x256xbf16>
    %c2 = arith.constant 2 : index
    %c0_54 = arith.constant 0 : index
    %c0_55 = arith.constant 0 : index
    %141 = vector.load %arg4[%c2, %c0_54, %c0_55] : memref<4x256x128xbf16, #tpu.memory_space<vmem>>, vector<1x256x128xbf16>
    %142 = vector.shape_cast %141 : vector<1x256x128xbf16> to vector<256x128xbf16>
    %cst_56 = arith.constant dense<0.000000e+00> : vector<1x128xf32>
    %143 = tpu.matmul %140, %142, %cst_56 {dimension_numbers = #tpu.dot_dimension_numbers<[1], [0], [0], [1], [0, 0, 1, 1], [], []>} : vector<1x256xbf16>, vector<256x128xbf16>, vector<1x128xf32> -> vector<1x128xf32>
    %144 = arith.addf %139, %143 : vector<1x128xf32>
    %145 = vector.extract_strided_slice %128 {offsets = [3, 0], sizes = [1, 256], strides = [1, 1]} : vector<4x256xbf16> to vector<1x256xbf16>
    %c3 = arith.constant 3 : index
    %c0_57 = arith.constant 0 : index
    %c0_58 = arith.constant 0 : index
    %146 = vector.load %arg4[%c3, %c0_57, %c0_58] : memref<4x256x128xbf16, #tpu.memory_space<vmem>>, vector<1x256x128xbf16>
    %147 = vector.shape_cast %146 : vector<1x256x128xbf16> to vector<256x128xbf16>
    %cst_59 = arith.constant dense<0.000000e+00> : vector<1x128xf32>
    %148 = tpu.matmul %145, %147, %cst_59 {dimension_numbers = #tpu.dot_dimension_numbers<[1], [0], [0], [1], [0, 0, 1, 1], [], []>} : vector<1x256xbf16>, vector<256x128xbf16>, vector<1x128xf32> -> vector<1x128xf32>
    %149 = arith.addf %144, %148 : vector<1x128xf32>
    %c0_60 = arith.constant 0 : index
    %c0_61 = arith.constant 0 : index
    %c0_62 = arith.constant 0 : index
    %150 = vector.load %arg6[%c0_60, %c0_61, %c0_62] : memref<1x1x128xf32, #tpu.memory_space<vmem>>, vector<1x1x128xf32>
    %151 = vector.shape_cast %150 : vector<1x1x128xf32> to vector<1x128xf32>
    %152 = arith.addf %151, %149 : vector<1x128xf32>
    %c0_63 = arith.constant 0 : index
    %c0_64 = arith.constant 0 : index
    %c0_65 = arith.constant 0 : index
    %153 = vector.load %arg6[%c0_63, %c0_64, %c0_65] : memref<1x1x128xf32, #tpu.memory_space<vmem>>, vector<1x1x128xf32>
    %154 = vector.shape_cast %153 : vector<1x1x128xf32> to vector<1x128xf32>
    %155 = vector.shape_cast %152 : vector<1x128xf32> to vector<1x1x128xf32>
    tpu.vector_store %arg6[%c0_63, %c0_64, %c0_65], %155 {strides = array<i32>} : memref<1x1x128xf32, #tpu.memory_space<vmem>>, vector<1x1x128xf32>,
    return
  }
  func.func @transform_0(%arg0: i32, %arg1: i32) -> (i32, i32, i32) {
    %c0_i32 = arith.constant 0 : i32
    %c0_i32_0 = arith.constant 0 : i32
    return %arg0, %c0_i32, %arg1 : i32, i32, i32
  }
  func.func @transform_1(%arg0: i32, %arg1: i32) -> (i32, i32, i32) {
    %c0_i32 = arith.constant 0 : i32
    %c0_i32_0 = arith.constant 0 : i32
    %c0_i32_1 = arith.constant 0 : i32
    return %arg0, %c0_i32, %c0_i32_0 : i32, i32, i32
  }
  func.func @transform_2(%arg0: i32, %arg1: i32) -> (i32, i32, i32) {
    %c0_i32 = arith.constant 0 : i32
    %c0_i32_0 = arith.constant 0 : i32
    %c0_i32_1 = arith.constant 0 : i32
    return %c0_i32, %arg1, %c0_i32_0 : i32, i32, i32
  }
  func.func @transform_3(%arg0: i32, %arg1: i32) -> (i32, i32) {
    %c0_i32 = arith.constant 0 : i32
    %c0_i32_0 = arith.constant 0 : i32
    %c0_i32_1 = arith.constant 0 : i32
    return %c0_i32, %c0_i32_0 : i32, i32
  }
  func.func @transform_4(%arg0: i32, %arg1: i32) -> (i32, i32, i32) {
    %c0_i32 = arith.constant 0 : i32
    %c0_i32_0 = arith.constant 0 : i32
    %c0_i32_1 = arith.constant 0 : i32
    return %arg0, %c0_i32, %c0_i32_0 : i32, i32, i32
  }
}

</mosaic_0001>

<bundles_post_ra>
// kernel: tpu_custom_call.1
= control target key start
LH: loop header
LB: loop body
LE: loop exit
PB: predicated region body
PF: predicated region fallthrough
CT: control target
= control target key end

     0   :  { %s3751_s0 = inlined_call_operand.hbm [shape: f32[2,2,256], index: 0, kind: input, shape index: {}]   ;;  %s3752_s1 = inlined_call_operand.hbm [shape: bf16[2,4,256], index: 1, kind: input, shape index: {}]   ;;  %s3753_s2 = inlined_call_operand.hbm [shape: bf16[4,256,128], index: 2, kind: input, shape index: {}]   ;;  %s3754_s3 = inlined_call_operand.vmem [shape: f32[1,128], index: 3, kind: input, shape index: {}]   ;;  %s3755_s4 = inlined_call_operand.hbm [shape: f32[2,1,128], index: 4, kind: output, shape index: {}]  }
   0x1   :  { %3762 = sst [smem:[#allocation15_spill]] %s3753_s2 }
   0x2   :  { %9 = vsyncpa [#allocation3], 0 }
   0x3   :  { %11 = vsyncpa [#allocation3 + $0x1], 0 }
   0x4   :  { %12 = vsyncpa [#allocation6], 0 }
   0x5   :  { %14 = vsyncpa [#allocation6 + $0x1], 0 }
   0x6   :  { %15 = vsyncpa [#allocation4], 0 }
   0x7   :  { %17 = vsyncpa [#allocation4 + $0x1], 0  ;;  %s2609_s15 = smov 0   ;;  %s2611_s16 = smov 0  }
   0x8   :  { %s2613_s17 = smov 0   ;;  %s2615_s18 = smov 0  }
   0x9   :  { %s2617_s19 = smov 0   ;;  %s2619_s20 = smov 0  }
   0xa LB: > { %3763 = sst [smem:[#allocation13_spill]] %s2572_s19  ;;  %s2640_s21 = sadd.s32 4294967295, %s2576_s20   ;;  %s2576_s20 = sphi %s2619_s20, %s23_s20   ;;  %s2572_s19 = sphi %s2617_s19, %s3790_s19   ;;  %s2568_s18 = sphi %s2615_s18, %s3789_s18   ;;  %s2564_s17 = sphi %s2613_s17, %s3793_s17   ;;  %s2560_s16 = sphi %s2611_s16, %s3792_s16   ;;  %s2556_s15 = sphi %s2609_s15, %s3791_s15  }
   0xb   : > { %s2075_s22 = sadd.s32 4294967294, %s2576_s20   ;;  %p57_p0 = scmp.ne.s32.totalorder %s2560_s16, %s2556_s15 }
   0xc   : > { %p3756_p1 = scmp.eq.s32.totalorder %s2640_s21, 0  ;;  %p160_p3 = scmp.eq.s32.totalorder %s2075_s22, 1 }
   0xd   : > { %p2076_p5 = scmp.ge.s32.totalorder %s2576_s20, 1  ;;  %p167_p7 = scmp.lt.s32.totalorder %s2576_s20, 3 }
   0xe   : > { %p2649_p4 = por %p3756_p1, %p57_p0  ;;  %p2654_p6 = por %p160_p3, %p57_p0 }
   0xf   : > { %p2659_p8 = pnand %p2076_p5, %p167_p7  ;;  %s2578_s26 = smov [#allocation7]  }
  0x10   : > { %s3764_s23 = scalar_select %p2649_p4, 1, 0 }
  0x11   : > { %s3765_s24 = scalar_select %p2654_p6, 1, 0 }
  0x12   : > { %s3766_s25 = scalar_select %p2659_p8, 1, 0 }
  0x13   : > { %s182_s27 = sshll.u32 %s2578_s26, 4  ;;  %p2264_p9 = pneg %p2659_p8  ;;  %s183_s27 = int_to_ptr.vmem [resolvable:$true] %s182_s27 }
  0x14   : > { %s35_s29 = sadd.s32 1, %s2572_s19  ;;  %s3768_s2 = sld [smem:[#allocation15_spill]] }
  0x15   : > { %p2668_p11 = pnand %p2264_p9, %p3756_p1 }
  0x17   : > { %p2400_p13 = pneg %p2668_p11 }
  0x1a   : > { %s2398_s6 = scalar_lea.hbm %s3768_s2, 8192 }
  0x1b   : > { %p2399_p12 = scmp.ne.s32.totalorder %s3768_s2, %s2398_s6  ;;  %p2405_p5 = scmp.lt.u32.totalorder %s2398_s6, %s3768_s2 }
  0x1d   : > { %p2401_p0 = pnand %p2400_p13, %p2399_p12 }
  0x1f   : > { %p2402_p3 = pneg %p2401_p0 }
  0x21   : > { %p2407_p7 = pnand %p2405_p5, %p2402_p3 }
  0x23   : > { %2410 = shalt.err (!%p2407_p7)
}
  0x24   : > { %s2411_s11 = scalar_lea.vmem %s183_s27, 8192  ;;  %p2419_p2 = scmp.lt.s32.totalorder %s183_s27, %s183_s27 }
  0x25   : > { %p2412_p9 = scmp.ne.s32.totalorder %s183_s27, %s2411_s11  ;;  %p2420_p6 = scmp.lt.s32.totalorder %s2411_s11, %s2411_s11 }
  0x27   : > { %p2414_p10 = pnand %p2412_p9, %p2400_p13  ;;  %p2421_p4 = por %p2420_p6, %p2419_p2 }
  0x29   : > { %p2415_p1 = pneg %p2414_p10 }
  0x2b   : > { %p2422_p8 = pnand %p2421_p4, %p2415_p1 }
  0x2d   : > { %2425 = shalt.err (!%p2422_p8)
}
  0x2e   : > { %s2579_s12 = smov 64   ;;  %s2580_s13 = smov 4  }
  0x2f   : > { %2267 = dma.hbm_to_vmem [thread:$0]  (!%p2668_p11), %s3768_s2, 8192, %s183_s27, [#allocation6], %s2579_s12, %s2579_s12, %s2580_s13  }
  0x30   : > { %p37_p1 = scmp.ge.s32.totalorder %s35_s29, 2  ;;  %s44_s26 = sadd.s32 1, %s2564_s17 }
  0x31   : > { %p51_p2 = scmp.ne.s32.totalorder %s2564_s17, %s2560_s16  ;;  %p52_p4 = scmp.eq.s32.totalorder %s2576_s20, 0 }
  0x32   : > { %s3795_s29 = smov (%p37_p1, %s35_s29), 0  ;;  %p3771_p8 = scmp.eq.s32.totalorder %s2640_s21, 1 }
  0x33   : > { %3769 = sst [smem:[#allocation14_spill]] %s3795_s29  ;;  %p2695_p6 = por %p52_p4, %p51_p2 }
  0x34   : > { %p2701_p10 = por %p3771_p8, %p51_p2  ;;  %s39_s5 = ssub.s32 %s2572_s19, %s3795_s29 }
  0x35   : > { %p2280_p11 = scmp.lt.s32.totalorder %s2576_s20, 2  ;;  %p42_p12 = scmp.eq.s32.totalorder %s39_s5, 0 }
  0x36   : > { %s3772_s28 = scalar_select %p2701_p10, 1, 0 }
  0x37   : > { %s199_s27 = sand.u32 1, %s2564_s17   ;;  %s2160_s8 = sshll.u32 %s2572_s19, 6 }
  0x38   : > { %s2709_s6 = sshll.u32 %s199_s27, 2  ;;  %s2718_s11 = scalar_lea.hbm %s3751_s0, %s2160_s8 }
  0x39   : > { %s2712_s7 = scalar_select %p42_p12, %s2564_s17, %s44_s26  }
  0x3a   : > { %s203_s12 = scalar_lea.vmem [#allocation2], %s2709_s6  ;;  %p2725_p13 = pnand %p2280_p11, %p2695_p6 }
  0x3b   : > { %s213_s13 = sshll.u32 %s203_s12, 4  ;;  %s2732_s5 = scalar_lea.hbm %s3752_s1, %s2160_s8  ;;  %s2721_s13 = int_to_ptr.vmem [resolvable:$true] %s213_s13 }
  0x3c   : > { %s220_s9 = sand.u32 1, %s2576_s20   ;;  %s200_s10 = scalar_lea.sflag [#allocation3], %s199_s27 }
  0x3d   : > { %s2426_s2 = scalar_lea.hbm %s2718_s11, 64  ;;  %p2428_p3 = pneg %p2725_p13 }
  0x3e   : > { %p2427_p0 = scmp.ne.s32.totalorder %s2718_s11, %s2426_s2  ;;  %s2431_s29 = scalar_lea.hbm %s3751_s0, 128 }
  0x3f   : > { %p2432_p9 = scmp.lt.u32.totalorder %s2718_s11, %s3751_s0  ;;  %p2433_p1 = scmp.lt.u32.totalorder %s2431_s29, %s2426_s2 }
  0x40   : > { %p2429_p5 = pnand %p2428_p3, %p2427_p0  ;;  %p2435_p4 = scmp.lt.u32.totalorder %s2426_s2, %s2718_s11 }
  0x41   : > { %p2434_p2 = por %p2433_p1, %p2432_p9 }
  0x42   : > { %p2430_p7 = pneg %p2429_p5 }
  0x43   : > { %p2436_p6 = por %p2435_p4, %p2434_p2 }
  0x45   : > { %p2437_p8 = pnand %p2436_p6, %p2430_p7 }
  0x47   : > { %2440 = shalt.err (!%p2437_p8)
}
  0x48   : > { %s2441_s27 = scalar_lea.vmem %s2721_s13, 64  ;;  %s2581_s8 = smov [#allocation2]  }
  0x49   : > { %p2442_p11 = scmp.ne.s32.totalorder %s2721_s13, %s2441_s27  ;;  %s2446_s26 = sshll.u32 %s2581_s8, 4  ;;  %s2447_s26 = int_to_ptr.vmem [resolvable:$false] %s2446_s26 }
  0x4a   : > { %s2448_s19 = scalar_lea.vmem %s2447_s26, 128  ;;  %p2449_p5 = scmp.lt.s32.totalorder %s2721_s13, %s2447_s26 }
  0x4b   : > { %p2444_p12 = pnand %p2442_p11, %p2428_p3  ;;  %p2450_p9 = scmp.lt.s32.totalorder %s2448_s19, %s2441_s27 }
  0x4d   : > { %p2445_p0 = pneg %p2444_p12  ;;  %p2451_p1 = por %p2450_p9, %p2449_p5 }
  0x4f   : > { %p2452_p2 = pnand %p2451_p1, %p2445_p0 }
  0x51   : > { %2455 = shalt.err (!%p2452_p2)
}
  0x52   : > { %2271 = dma.hbm_to_vmem [thread:$0]  (!%p2725_p13), %s2718_s11, 64, %s2721_s13, %s200_s10  }
  0x53   : > { %s224_s2 = scalar_lea.vmem [#allocation5], %s2709_s6  ;;  %s221_s30 = scalar_lea.sflag [#allocation6], %s220_s9 }
  0x54   : > { %s232_s29 = sshll.u32 %s224_s2, 4  ;;  %s2456_s12 = scalar_lea.hbm %s2732_s5, 64  ;;  %s233_s29 = int_to_ptr.vmem [resolvable:$true] %s232_s29 }
  0x55   : > { %p2457_p7 = scmp.ne.s32.totalorder %s2732_s5, %s2456_s12  ;;  %s2461_s8 = scalar_lea.hbm %s3752_s1, 128 }
  0x56   : > { %p2462_p8 = scmp.lt.u32.totalorder %s2732_s5, %s3752_s1  ;;  %p2463_p11 = scmp.lt.u32.totalorder %s2461_s8, %s2456_s12 }
  0x57   : > { %p2459_p4 = pnand %p2457_p7, %p2428_p3  ;;  %p2465_p0 = scmp.lt.u32.totalorder %s2456_s12, %s2732_s5 }
  0x58   : > { %p2464_p12 = por %p2463_p11, %p2462_p8 }
  0x59   : > { %p2460_p6 = pneg %p2459_p4 }
  0x5a   : > { %p2466_p5 = por %p2465_p0, %p2464_p12 }
  0x5c   : > { %p2467_p9 = pnand %p2466_p5, %p2460_p6 }
  0x5e   : > { %2470 = shalt.err (!%p2467_p9)
}
  0x5f   : > { %s2471_s6 = scalar_lea.vmem %s233_s29, 64  ;;  %s2582_s11 = smov [#allocation5]  }
  0x60   : > { %p2472_p1 = scmp.ne.s32.totalorder %s233_s29, %s2471_s6  ;;  %s2476_s13 = sshll.u32 %s2582_s11, 4  ;;  %s2477_s13 = int_to_ptr.vmem [resolvable:$false] %s2476_s13 }
  0x61   : > { %s2478_s9 = scalar_lea.vmem %s2477_s13, 128  ;;  %p2479_p4 = scmp.lt.s32.totalorder %s233_s29, %s2477_s13 }
  0x62   : > { %p2474_p2 = pnand %p2472_p1, %p2428_p3  ;;  %p2480_p10 = scmp.lt.s32.totalorder %s2478_s9, %s2471_s6 }
  0x64   : > { %p2475_p7 = pneg %p2474_p2  ;;  %p2481_p8 = por %p2480_p10, %p2479_p4 }
  0x66   : > { %p2482_p11 = pnand %p2481_p8, %p2475_p7 }
  0x68   : > { %2485 = shalt.err (!%p2482_p11)
}
  0x69   : > { %2274 = dma.hbm_to_vmem [thread:$0]  (!%p2725_p13), %s2732_s5, 64, %s233_s29, %s221_s30  }
  0x6a   : > { %p3774_p6 = scmp.ne.s32.totalorder %s3766_s25, 0 }
  0x6b   : > { %s2785_s10 = sand.u32 (!%p3774_p6), 1, %s2560_s16   ;;  %p3775_p3 = scmp.ne.s32.totalorder (!%p3774_p6), %s3764_s23, 0 }
  0x6c   : > { %241 = sbr.rel (%p3774_p6) target bundleno = 864 (0x360), region = 36  ;;  %s2086_s2 = sshll.u32 (!%p3774_p6), %s2785_s10, 2 }
  0x6d   : > { %s244_s12 = scalar_lea.sflag (!%p3774_p6), [#allocation3], %s2785_s10  ;;  %s247_s22 = scalar_lea.vmem (!%p3774_p6), [#allocation2], %s2086_s2 }
  0x73   : > { %2539 = dma.done.wait (%p3775_p3), %s244_s12, 64  }
  0x74   : > { %2541 = vsyncadd (%p3775_p3), %s244_s12, 4294967232  ;;  %s252_s14 = sand.u32 1, %s2640_s21   ;;  %s2794_s25 = scalar_lea.vmem [#allocation5], %s2086_s2 }
  0x75   : > { %s253_s5 = scalar_lea.sflag [#allocation6], %s252_s14 }
  0x76   : > { %2543 = dma.done.wait (%p3775_p3), %s253_s5, 64  }
  0x77   : > { %2545 = vsyncadd (%p3775_p3), %s253_s5, 4294967232  ;;  %p3776_p10 = scmp.eq.s32.totalorder %s2640_s21, 0 }
  0x79   : > { %2547 = dma.done.wait (%p3776_p10), [#allocation6], 8192   ;;  %p3777_p13 = pmov %p3776_p10 }
  0x7a   : > { %v298_v0 = vlaneseq  ;;  %v331_v7 = vld [vmem:[%s247_s22] ss:$2 sm:$0x3]  ;;  %v2089_v8 = vld [vmem:[%s247_s22 + $0x1] ss:$2 sm:$0x3] }
  0x7b   : > { %2549 = vsyncadd (%p3777_p13), [#allocation6], 4294959104  ;;  %v334_v9 = vadd.f32 1.0, %v331_v7  ;;  %v340_v10 = vadd.f32 1.0, %v2089_v8  ;;  %s3692_s29 = scalar_lea.vmem [#allocation8], %s2785_s10  ;;  %s2157_s30 = sshll.u32 %s2568_s18, 4 }
  0x7c   : > { %v2804_v1 = vshrl.u32 %v298_v0, 7  ;;  %s1963_s27 = sshll.u32 %s3692_s29, 4  ;;  %s3701_s19 = scalar_lea.hbm %s3755_s4, %s2157_s30  ;;  %s3703_s27 = int_to_ptr.vmem [resolvable:$true] %s1963_s27 }
  0x7d   : > { %v335_v17 = vmul.f32 16.0, %v334_v9  ;;  %v341_v18 = vmul.f32 16.0, %v340_v10  ;;  %s1951_s6 = scalar_lea.sflag [#allocation4], %s2785_s10  ;;  %s2486_s11 = scalar_lea.vmem %s3703_s27, 16 }
  0x7e   : > { %v2807_v2 = vadd.s32 8, %v2804_v1  ;;  %v2810_v3 = vsub.s32 1, %v2804_v1  ;;  %v2813_v4 = vsub.s32 0, %v2804_v1  ;;  %v2816_v5 = vadd.s32 16, %v2804_v1  ;;  %p2487_p12 = scmp.ne.s32.totalorder %s3703_s27, %s2486_s11  ;;  %p3786_p0 = scmp.ne.s32.totalorder %s3772_s28, 0 }
  0x7f   : > { %v2819_v6 = vadd.s32 24, %v2804_v1  ;;  %v2822_v11 = vadd.s32 32, %v2804_v1  ;;  %v2825_v12 = vadd.s32 40, %v2804_v1  ;;  %v2828_v13 = vadd.s32 48, %v2804_v1  ;;  %s2583_s18 = smov [#allocation8]  }
  0x80   : > { %v2831_v14 = vadd.s32 56, %v2804_v1  ;;  %v2834_v15 = vadd.s32 64, %v2804_v1  ;;  %v2837_v16 = vadd.s32 72, %v2804_v1  ;;  %v2840_v19 = vadd.s32 80, %v2804_v1  ;;  %p2488_p5 = pnand %p2487_p12, %p3786_p0  ;;  %s2490_s13 = sshll.u32 %s2583_s18, 4  ;;  %s2491_s13 = int_to_ptr.vmem [resolvable:$false] %s2490_s13 }
  0x81   : > { %v2843_v20 = vadd.s32 88, %v2804_v1  ;;  %v2846_v21 = vadd.s32 96, %v2804_v1  ;;  %v2849_v22 = vadd.s32 104, %v2804_v1  ;;  %v2090_v23 = vadd.f32 -1.0, %v335_v17  ;;  %s2492_s9 = scalar_lea.vmem %s2491_s13, 32  ;;  %p2493_p1 = scmp.lt.s32.totalorder %s3703_s27, %s2491_s13 }
  0x82   : > { %v2091_v24 = vadd.f32 -1.0, %v341_v18  ;;  %v2852_v33 = vadd.s32 112, %v2804_v1  ;;  %v2855_v34 = vadd.s32 120, %v2804_v1  ;;  %v2870_v51 = vadd.s32 128, %v2804_v1  ;;  %p2489_p9 = pneg %p2488_p5  ;;  %p2494_p2 = scmp.lt.s32.totalorder %s2492_s9, %s2486_s11 }
  0x83   : > { %v337_v25 = vmul.f32 0.5, %v2090_v23  ;;  %v2877_v54 = vadd.s32 136, %v2804_v1  ;;  %v2880_v55 = vadd.s32 144, %v2804_v1  ;;  %v2887_v58 = vadd.s32 152, %v2804_v1 }
  0x84   : > { %v343_v26 = vmul.f32 0.5, %v2091_v24  ;;  %v2890_v59 = vadd.s32 160, %v2804_v1  ;;  %v2897_v61 = vadd.s32 168, %v2804_v1  ;;  %p2495_p7 = por %p2494_p2, %p2493_p1 }
  0x85   : > { %v338_v27 = vmax.f32 %v337_v25, -2.0 }
  0x86   : > { %v344_v28 = vmax.f32 %v343_v26, -2.0  ;;  %p2496_p4 = pnand %p2495_p7, %p2489_p9 }
  0x87   : > { %v339_v29 = vmin.f32 %v338_v27, 17.0 }
  0x88   : > { %v345_v30 = vmin.f32 %v344_v28, 17.0 }
  0x89   : > { %v346_v31 = vfloor.f32 %v339_v29 }
  0x8a   : > { %v347_v32 = vfloor.f32 %v345_v30 }
  0x8b   : > { %v348_v35 = vsub.f32 %v339_v29, %v346_v31  ;;  %v2250_v37 = vtrunc.f32 %v346_v31 }
  0x8c   : > { %v349_v36 = vsub.f32 %v345_v30, %v347_v32  ;;  %v2252_v38 = vtrunc.f32 %v347_v32 }
  0x8d   : > { %v2251_v39 = vcvt.f32.s32 %v2250_v37  ;;  %v368_v42 = vsub.f32 1.0, %v348_v35 }
  0x8e   : > { %v2253_v40 = vcvt.f32.s32 %v2252_v38  ;;  %v367_v41 = vsub.f32 1.0, %v349_v36  ;;  %v378_v56 = vmul.f32 %v349_v36, %v348_v35 }
  0x8f   : > { %v352_v43 = vadd.s32 1, %v2251_v39  ;;  %vm354_vm0 = vcmp.ge.s32.totalorder %v2251_v39, 0  ;;  %vm355_vm1 = vcmp.lt.s32.totalorder %v2251_v39, 16  ;;  %v375_v53 = vmul.f32 %v368_v42, %v349_v36 }
  0x90   : > { %v353_v44 = vadd.s32 1, %v2253_v40  ;;  %vm2857_vm2 = vmand %vm354_vm0, %vm355_vm1  ;;  %vm360_vm3 = vcmp.ge.s32.totalorder %v2253_v40, 0  ;;  %vm361_vm4 = vcmp.lt.s32.totalorder %v2253_v40, 16  ;;  %v369_v46 = vmul.f32 %v368_v42, %v367_v41 }
  0x91   : > { %vm357_vm5 = vcmp.ge.s32.totalorder %v352_v43, 0  ;;  %vm358_vm6 = vcmp.lt.s32.totalorder %v352_v43, 16  ;;  %vm2861_vm7 = vmand %vm360_vm3, %vm361_vm4  ;;  %v372_v49 = vmul.f32 %v367_v41, %v348_v35  ;;  %v380_v50 = vmul.u32 16, %v2253_v40 }
  0x92   : > { %vm363_vm8 = vcmp.ge.s32.totalorder %v353_v44, 0  ;;  %vm364_vm9 = vcmp.lt.s32.totalorder %v353_v44, 16  ;;  %vm2865_vm10 = vmand %vm357_vm5, %vm358_vm6 }
  0x93   : > { %vm2872_vm11 = vmand %vm363_vm8, %vm364_vm9  ;;  %v381_v57 = vadd.s32 %v2251_v39, %v380_v50 }
  0x94   : > { %vm366_vm12 = vmand %vm2861_vm7, %vm2857_vm2 }
  0x95   : > { %v370_v60 = vsel %vm366_vm12, %v369_v46, 0.0  ;;  %vm371_vm13 = vmand %vm2861_vm7, %vm2865_vm10  ;;  %v2904_v63 = vrot.slane %v381_v57, %v2810_v3  ;;  %v529_v7 = vadd.s32 1, %v381_v57  ;;  %v741_v10 = vadd.s32 16, %v381_v57 }
  0x96   : > { %v373_v62 = vsel %vm371_vm13, %v372_v49, 0.0  ;;  %vm374_vm14 = vmand %vm2872_vm11, %vm2857_vm2  ;;  %v2907_v0 = vrot.slane %v370_v60, %v2810_v3  ;;  %v2917_v17 = vrot.slane %v381_v57, %v2813_v4  ;;  %v2957_v39 = vrot.slane %v370_v60, %v2813_v4 }
  0x97   : > { %v376_v8 = vsel %vm374_vm14, %v375_v53, 0.0  ;;  %vm377_vm15 = vmand %vm2872_vm11, %vm2865_vm10  ;;  %v2914_v9 = vrot.slane %v373_v62, %v2810_v3  ;;  %vm391_vm0 = vcmp.eq.s32.totalorder %v2804_v1, %v2904_v63  ;;  %vm393_vm1 = vcmp.eq.s32.totalorder %v2807_v2, %v2904_v63 }
  0x98   : > { %v379_v18 = vsel %vm377_vm15, %v378_v56, 0.0  ;;  %v2924_v23 = vrot.slane %v529_v7, %v2810_v3  ;;  %v466_v24 = vsel %vm391_vm0, %v2907_v0, 0.0  ;;  %v468_v25 = vsel %vm393_vm1, %v2907_v0, 0.0 }
  0x99   : > { %v2929_v26 = vrot.slane %v741_v10, %v2810_v3  ;;  %v2932_v27 = vrot.slane %v376_v8, %v2810_v3  ;;  %v953_v28 = vadd.s32 1, %v741_v10  ;;  %v2939_v29 = vrot.slane %v379_v18, %v2810_v3 }
  0x9a   : > { %vm539_vm2 = vcmp.eq.s32.totalorder %v2804_v1, %v2924_v23  ;;  %vm541_vm3 = vcmp.eq.s32.totalorder %v2807_v2, %v2924_v23  ;;  %vm390_vm6 = vcmp.eq.s32.totalorder %v2804_v1, %v2917_v17  ;;  %vm392_vm7 = vcmp.eq.s32.totalorder %v2807_v2, %v2917_v17 }
  0x9b   : > { %v614_v30 = vsel %vm539_vm2, %v2914_v9, 0.0  ;;  %v616_v31 = vsel %vm541_vm3, %v2914_v9, 0.0  ;;  %vm751_vm4 = vcmp.eq.s32.totalorder %v2804_v1, %v2929_v26  ;;  %vm753_vm5 = vcmp.eq.s32.totalorder %v2807_v2, %v2929_v26 }
  0x9c   : > { %v678_v32 = vadd.f32 %v614_v30, %v466_v24  ;;  %v680_v35 = vadd.f32 %v616_v31, %v468_v25  ;;  %v826_v36 = vsel %vm751_vm4, %v2932_v27, 0.0  ;;  %v828_v37 = vsel %vm753_vm5, %v2932_v27, 0.0 }
  0x9d   : > { %v2950_v38 = vrot.slane %v953_v28, %v2810_v3  ;;  %v2960_v42 = vrot.slane %v529_v7, %v2813_v4  ;;  %v2963_v43 = vrot.slane %v373_v62, %v2813_v4  ;;  %v465_v3 = vsel %vm390_vm6, %v2957_v39, 0.0 }
  0x9e   : > { %v890_v40 = vadd.f32 %v826_v36, %v678_v32  ;;  %v892_v41 = vadd.f32 %v828_v37, %v680_v35  ;;  %v467_v44 = vsel %vm392_vm7, %v2957_v39, 0.0  ;;  %v2980_v56 = vrot.slane %v741_v10, %v2813_v4 }
  0x9f   : > { %vm963_vm8 = vcmp.eq.s32.totalorder %v2804_v1, %v2950_v38  ;;  %vm965_vm9 = vcmp.eq.s32.totalorder %v2807_v2, %v2950_v38  ;;  %vm538_vm10 = vcmp.eq.s32.totalorder %v2804_v1, %v2960_v42  ;;  %vm540_vm11 = vcmp.eq.s32.totalorder %v2807_v2, %v2960_v42 }
  0xa0   : > { %v1038_v45 = vsel %vm963_vm8, %v2939_v29, 0.0  ;;  %v1040_v46 = vsel %vm965_vm9, %v2939_v29, 0.0  ;;  %v613_v49 = vsel %vm538_vm10, %v2963_v43, 0.0  ;;  %v615_v50 = vsel %vm540_vm11, %v2963_v43, 0.0 }
  0xa1   : > { %v1102_v47 = vadd.f32 %v1038_v45, %v890_v40  ;;  %v1104_v48 = vadd.f32 %v1040_v46, %v892_v41  ;;  %v677_v52 = vadd.f32 %v613_v49, %v465_v3  ;;  %v679_v53 = vadd.f32 %v615_v50, %v467_v44 }
  0xa2   : > { %v2983_v57 = vrot.slane %v376_v8, %v2813_v4  ;;  %v2986_v62 = vrot.slane %v953_v28, %v2813_v4  ;;  %v2989_v7 = vrot.slane %v379_v18, %v2813_v4  ;;  %vm395_vm12 = vcmp.eq.s32.totalorder %v2816_v5, %v2904_v63 }
  0xa3   : > { %v1167_v60 = vpack.c.bf16 %v1104_v48, %v1102_v47  ;;  %vm750_vm13 = vcmp.eq.s32.totalorder %v2804_v1, %v2980_v56  ;;  %vm752_vm14 = vcmp.eq.s32.totalorder %v2807_v2, %v2980_v56  ;;  %vm397_vm15 = vcmp.eq.s32.totalorder %v2819_v6, %v2904_v63 }
  0xa4   : > { %v470_v8 = vsel %vm395_vm12, %v2907_v0, 0.0  ;;  %v825_v10 = vsel %vm750_vm13, %v2983_v57, 0.0  ;;  %v827_v4 = vsel %vm752_vm14, %v2983_v57, 0.0  ;;  %vm962_vm0 = vcmp.eq.s32.totalorder %v2804_v1, %v2986_v62 }
  0xa5   : > { %1209 = vmatprep.subr.bf16.mxu0 %v1167_v60  ;;  %vm964_vm1 = vcmp.eq.s32.totalorder %v2807_v2, %v2986_v62  ;;  %v889_v18 = vadd.f32 %v825_v10, %v677_v52  ;;  %v891_v24 = vadd.f32 %v827_v4, %v679_v53  ;;  %v1037_v25 = vsel %vm962_vm0, %v2989_v7, 0.0 }
  0xa6   : > { %v1039_v28 = vsel %vm964_vm1, %v2989_v7, 0.0  ;;  %v472_v30 = vsel %vm397_vm15, %v2907_v0, 0.0  ;;  %vm543_vm2 = vcmp.eq.s32.totalorder %v2816_v5, %v2924_v23  ;;  %vm545_vm3 = vcmp.eq.s32.totalorder %v2819_v6, %v2924_v23 }
  0xa7   : > { %vm755_vm4 = vcmp.eq.s32.totalorder %v2816_v5, %v2929_v26  ;;  %v1101_v31 = vadd.f32 %v1037_v25, %v889_v18  ;;  %v1103_v32 = vadd.f32 %v1039_v28, %v891_v24  ;;  %v618_v2 = vsel %vm543_vm2, %v2914_v9, 0.0 }
  0xa8   : > { %v620_v35 = vsel %vm545_vm3, %v2914_v9, 0.0  ;;  %v682_v36 = vadd.f32 %v618_v2, %v470_v8  ;;  %vm757_vm5 = vcmp.eq.s32.totalorder %v2819_v6, %v2929_v26  ;;  %v830_v40 = vsel %vm755_vm4, %v2932_v27, 0.0 }
  0xa9   : > { %v684_v37 = vadd.f32 %v620_v35, %v472_v30  ;;  %v1166_v41 = vpack.c.bf16 %v1103_v32, %v1101_v31  ;;  %v832_v3 = vsel %vm757_vm5, %v2932_v27, 0.0  ;;  %vm967_vm6 = vcmp.eq.s32.totalorder %v2816_v5, %v2950_v38 }
  0xaa   : > { %vm969_vm7 = vcmp.eq.s32.totalorder %v2819_v6, %v2950_v38  ;;  %v894_v44 = vadd.f32 %v830_v40, %v682_v36  ;;  %v1042_v46 = vsel %vm967_vm6, %v2939_v29, 0.0  ;;  %vm394_vm8 = vcmp.eq.s32.totalorder %v2816_v5, %v2917_v17 }
  0xab   : > { %v896_v45 = vadd.f32 %v832_v3, %v684_v37  ;;  %v1044_v47 = vsel %vm969_vm7, %v2939_v29, 0.0  ;;  %1210 = vmatpush1.bf16.msra.mxu0 %v1166_v41  ;;  %vm396_vm9 = vcmp.eq.s32.totalorder %v2819_v6, %v2917_v17  ;;  %vm542_vm10 = vcmp.eq.s32.totalorder %v2816_v5, %v2960_v42 }
  0xac   : > { %vm544_vm11 = vcmp.eq.s32.totalorder %v2819_v6, %v2960_v42  ;;  %v1106_v48 = vadd.f32 %v1042_v46, %v894_v44  ;;  %v469_v50 = vsel %vm394_vm8, %v2957_v39, 0.0  ;;  %v471_v52 = vsel %vm396_vm9, %v2957_v39, 0.0 }
  0xad   : > { %v1108_v49 = vadd.f32 %v1044_v47, %v896_v45  ;;  %v617_v53 = vsel %vm542_vm10, %v2963_v43, 0.0  ;;  %v619_v60 = vsel %vm544_vm11, %v2963_v43, 0.0  ;;  %vm754_vm12 = vcmp.eq.s32.totalorder %v2816_v5, %v2980_v56 }
  0xae   : > { %vm756_vm13 = vcmp.eq.s32.totalorder %v2819_v6, %v2980_v56  ;;  %v681_v10 = vadd.f32 %v617_v53, %v469_v50  ;;  %v683_v4 = vadd.f32 %v619_v60, %v471_v52  ;;  %v829_v18 = vsel %vm754_vm12, %v2983_v57, 0.0 }
  0xaf   : > { %v1169_v8 = vpack.c.bf16 %v1108_v49, %v1106_v48  ;;  %v831_v24 = vsel %vm756_vm13, %v2983_v57, 0.0  ;;  %vm966_vm14 = vcmp.eq.s32.totalorder %v2816_v5, %v2986_v62  ;;  %vm968_vm15 = vcmp.eq.s32.totalorder %v2819_v6, %v2986_v62 }
  0xb0   : > { %vm399_vm0 = vcmp.eq.s32.totalorder %v2822_v11, %v2904_v63  ;;  %v893_v25 = vadd.f32 %v829_v18, %v681_v10  ;;  %v895_v28 = vadd.f32 %v831_v24, %v683_v4  ;;  %v1041_v30 = vsel %vm966_vm14, %v2989_v7, 0.0 }
  0xb1   : > { %1211 = vmatprep.subr.bf16.mxu0 %v1169_v8  ;;  %v1043_v31 = vsel %vm968_vm15, %v2989_v7, 0.0  ;;  %vm401_vm1 = vcmp.eq.s32.totalorder %v2825_v12, %v2904_v63  ;;  %v474_v32 = vsel %vm399_vm0, %v2907_v0, 0.0  ;;  %vm547_vm2 = vcmp.eq.s32.totalorder %v2822_v11, %v2924_v23 }
  0xb2   : > { %vm549_vm3 = vcmp.eq.s32.totalorder %v2825_v12, %v2924_v23  ;;  %v1105_v5 = vadd.f32 %v1041_v30, %v893_v25  ;;  %v1107_v6 = vadd.f32 %v1043_v31, %v895_v28  ;;  %v476_v2 = vsel %vm401_vm1, %v2907_v0, 0.0 }
  0xb3   : > { %v622_v35 = vsel %vm547_vm2, %v2914_v9, 0.0  ;;  %v624_v36 = vsel %vm549_vm3, %v2914_v9, 0.0  ;;  %vm759_vm4 = vcmp.eq.s32.totalorder %v2822_v11, %v2929_v26  ;;  %vm761_vm5 = vcmp.eq.s32.totalorder %v2825_v12, %v2929_v26 }
  0xb4   : > { %v686_v37 = vadd.f32 %v622_v35, %v474_v32  ;;  %v1168_v40 = vpack.c.bf16 %v1107_v6, %v1105_v5  ;;  %v688_v41 = vadd.f32 %v624_v36, %v476_v2  ;;  %v834_v3 = vsel %vm759_vm4, %v2932_v27, 0.0 }
  0xb5   : > { %v836_v44 = vsel %vm761_vm5, %v2932_v27, 0.0  ;;  %vm971_vm6 = vcmp.eq.s32.totalorder %v2822_v11, %v2950_v38  ;;  %vm973_vm7 = vcmp.eq.s32.totalorder %v2825_v12, %v2950_v38  ;;  %vm398_vm8 = vcmp.eq.s32.totalorder %v2822_v11, %v2917_v17 }
  0xb6   : > { %v898_v45 = vadd.f32 %v834_v3, %v686_v37  ;;  %1212 = vmatpush1.bf16.msra.mxu0 %v1168_v40  ;;  %v900_v46 = vadd.f32 %v836_v44, %v688_v41  ;;  %v1046_v47 = vsel %vm971_vm6, %v2939_v29, 0.0  ;;  %v1048_v48 = vsel %vm973_vm7, %v2939_v29, 0.0 }
  0xb7   : > { %vm400_vm9 = vcmp.eq.s32.totalorder %v2825_v12, %v2917_v17  ;;  %v473_v50 = vsel %vm398_vm8, %v2957_v39, 0.0  ;;  %vm546_vm10 = vcmp.eq.s32.totalorder %v2822_v11, %v2960_v42  ;;  %vm548_vm11 = vcmp.eq.s32.totalorder %v2825_v12, %v2960_v42 }
  0xb8   : > { %v1110_v49 = vadd.f32 %v1046_v47, %v898_v45  ;;  %v475_v52 = vsel %vm400_vm9, %v2957_v39, 0.0  ;;  %v1112_v53 = vadd.f32 %v1048_v48, %v900_v46  ;;  %v621_v60 = vsel %vm546_vm10, %v2963_v43, 0.0 }
  0xb9   : > { %vm758_vm12 = vcmp.eq.s32.totalorder %v2822_v11, %v2980_v56  ;;  %v623_v8 = vsel %vm548_vm11, %v2963_v43, 0.0  ;;  %v685_v10 = vadd.f32 %v621_v60, %v473_v50  ;;  %vm760_vm13 = vcmp.eq.s32.totalorder %v2825_v12, %v2980_v56 }
  0xba   : > { %v833_v4 = vsel %vm758_vm12, %v2983_v57, 0.0  ;;  %v1171_v18 = vpack.c.bf16 %v1112_v53, %v1110_v49  ;;  %v687_v24 = vadd.f32 %v623_v8, %v475_v52  ;;  %v835_v25 = vsel %vm760_vm13, %v2983_v57, 0.0 }
  0xbb   : > { %vm970_vm14 = vcmp.eq.s32.totalorder %v2822_v11, %v2986_v62  ;;  %v897_v28 = vadd.f32 %v833_v4, %v685_v10  ;;  %vm972_vm15 = vcmp.eq.s32.totalorder %v2825_v12, %v2986_v62  ;;  %vm403_vm0 = vcmp.eq.s32.totalorder %v2828_v13, %v2904_v63 }
  0xbc   : > { %v1045_v30 = vsel %vm970_vm14, %v2989_v7, 0.0  ;;  %1213 = vmatprep.subr.bf16.mxu0 %v1171_v18  ;;  %v899_v31 = vadd.f32 %v835_v25, %v687_v24  ;;  %v1047_v32 = vsel %vm972_vm15, %v2989_v7, 0.0  ;;  %vm405_vm1 = vcmp.eq.s32.totalorder %v2831_v14, %v2904_v63 }
  0xbd   : > { %v478_v5 = vsel %vm403_vm0, %v2907_v0, 0.0  ;;  %v1109_v6 = vadd.f32 %v1045_v30, %v897_v28  ;;  %v480_v11 = vsel %vm405_vm1, %v2907_v0, 0.0  ;;  %vm551_vm2 = vcmp.eq.s32.totalorder %v2828_v13, %v2924_v23 }
  0xbe   : > { %vm553_vm3 = vcmp.eq.s32.totalorder %v2831_v14, %v2924_v23  ;;  %v1111_v12 = vadd.f32 %v1047_v32, %v899_v31  ;;  %v626_v2 = vsel %vm551_vm2, %v2914_v9, 0.0  ;;  %vm763_vm4 = vcmp.eq.s32.totalorder %v2828_v13, %v2929_v26 }
  0xbf   : > { %v628_v35 = vsel %vm553_vm3, %v2914_v9, 0.0  ;;  %v690_v36 = vadd.f32 %v626_v2, %v478_v5  ;;  %vm765_vm5 = vcmp.eq.s32.totalorder %v2831_v14, %v2929_v26  ;;  %v838_v40 = vsel %vm763_vm4, %v2932_v27, 0.0 }
  0xc0   : > { %v692_v37 = vadd.f32 %v628_v35, %v480_v11  ;;  %v1170_v41 = vpack.c.bf16 %v1111_v12, %v1109_v6  ;;  %v840_v3 = vsel %vm765_vm5, %v2932_v27, 0.0  ;;  %vm975_vm6 = vcmp.eq.s32.totalorder %v2828_v13, %v2950_v38 }
  0xc1   : > { %vm977_vm7 = vcmp.eq.s32.totalorder %v2831_v14, %v2950_v38  ;;  %v902_v44 = vadd.f32 %v838_v40, %v690_v36  ;;  %v1050_v46 = vsel %vm975_vm6, %v2939_v29, 0.0  ;;  %vm402_vm8 = vcmp.eq.s32.totalorder %v2828_v13, %v2917_v17 }
  0xc2   : > { %v904_v45 = vadd.f32 %v840_v3, %v692_v37  ;;  %v1052_v47 = vsel %vm977_vm7, %v2939_v29, 0.0  ;;  %1214 = vmatpush1.bf16.msra.mxu0 %v1170_v41  ;;  %vm404_vm9 = vcmp.eq.s32.totalorder %v2831_v14, %v2917_v17  ;;  %vm550_vm10 = vcmp.eq.s32.totalorder %v2828_v13, %v2960_v42 }
  0xc3   : > { %vm552_vm11 = vcmp.eq.s32.totalorder %v2831_v14, %v2960_v42  ;;  %v1114_v48 = vadd.f32 %v1050_v46, %v902_v44  ;;  %v477_v50 = vsel %vm402_vm8, %v2957_v39, 0.0  ;;  %v479_v52 = vsel %vm404_vm9, %v2957_v39, 0.0 }
  0xc4   : > { %v1116_v49 = vadd.f32 %v1052_v47, %v904_v45  ;;  %v625_v53 = vsel %vm550_vm10, %v2963_v43, 0.0  ;;  %v627_v60 = vsel %vm552_vm11, %v2963_v43, 0.0  ;;  %vm762_vm12 = vcmp.eq.s32.totalorder %v2828_v13, %v2980_v56 }
  0xc5   : > { %vm764_vm13 = vcmp.eq.s32.totalorder %v2831_v14, %v2980_v56  ;;  %v689_v10 = vadd.f32 %v625_v53, %v477_v50  ;;  %v691_v4 = vadd.f32 %v627_v60, %v479_v52  ;;  %v837_v18 = vsel %vm762_vm12, %v2983_v57, 0.0 }
  0xc6   : > { %v1173_v8 = vpack.c.bf16 %v1116_v49, %v1114_v48  ;;  %v839_v24 = vsel %vm764_vm13, %v2983_v57, 0.0  ;;  %vm974_vm14 = vcmp.eq.s32.totalorder %v2828_v13, %v2986_v62  ;;  %vm976_vm15 = vcmp.eq.s32.totalorder %v2831_v14, %v2986_v62 }
  0xc7   : > { %vm407_vm0 = vcmp.eq.s32.totalorder %v2834_v15, %v2904_v63  ;;  %v901_v25 = vadd.f32 %v837_v18, %v689_v10  ;;  %v903_v28 = vadd.f32 %v839_v24, %v691_v4  ;;  %v1049_v30 = vsel %vm974_vm14, %v2989_v7, 0.0 }
  0xc8   : > { %1215 = vmatprep.subr.bf16.mxu0 %v1173_v8  ;;  %v1051_v31 = vsel %vm976_vm15, %v2989_v7, 0.0  ;;  %vm409_vm1 = vcmp.eq.s32.totalorder %v2837_v16, %v2904_v63  ;;  %v482_v32 = vsel %vm407_vm0, %v2907_v0, 0.0  ;;  %vm555_vm2 = vcmp.eq.s32.totalorder %v2834_v15, %v2924_v23 }
  0xc9   : > { %vm557_vm3 = vcmp.eq.s32.totalorder %v2837_v16, %v2924_v23  ;;  %v1113_v13 = vadd.f32 %v1049_v30, %v901_v25  ;;  %v1115_v14 = vadd.f32 %v1051_v31, %v903_v28  ;;  %v484_v5 = vsel %vm409_vm1, %v2907_v0, 0.0 }
  0xca   : > { %v630_v6 = vsel %vm555_vm2, %v2914_v9, 0.0  ;;  %v632_v11 = vsel %vm557_vm3, %v2914_v9, 0.0  ;;  %vm767_vm4 = vcmp.eq.s32.totalorder %v2834_v15, %v2929_v26  ;;  %vm769_vm5 = vcmp.eq.s32.totalorder %v2837_v16, %v2929_v26 }
  0xcb   : > { %v694_v12 = vadd.f32 %v630_v6, %v482_v32  ;;  %v1172_v2 = vpack.c.bf16 %v1115_v14, %v1113_v13  ;;  %v696_v35 = vadd.f32 %v632_v11, %v484_v5  ;;  %v842_v36 = vsel %vm767_vm4, %v2932_v27, 0.0 }
  0xcc   : > { %v844_v37 = vsel %vm769_vm5, %v2932_v27, 0.0  ;;  %vm979_vm6 = vcmp.eq.s32.totalorder %v2834_v15, %v2950_v38  ;;  %vm981_vm7 = vcmp.eq.s32.totalorder %v2837_v16, %v2950_v38  ;;  %vm406_vm8 = vcmp.eq.s32.totalorder %v2834_v15, %v2917_v17 }
  0xcd   : > { %v906_v40 = vadd.f32 %v842_v36, %v694_v12  ;;  %1216 = vmatpush1.bf16.msra.mxu0 %v1172_v2  ;;  %v908_v41 = vadd.f32 %v844_v37, %v696_v35  ;;  %v1054_v3 = vsel %vm979_vm6, %v2939_v29, 0.0  ;;  %v1056_v44 = vsel %vm981_vm7, %v2939_v29, 0.0 }
  0xce   : > { %vm408_vm9 = vcmp.eq.s32.totalorder %v2837_v16, %v2917_v17  ;;  %v481_v46 = vsel %vm406_vm8, %v2957_v39, 0.0  ;;  %vm554_vm10 = vcmp.eq.s32.totalorder %v2834_v15, %v2960_v42  ;;  %vm556_vm11 = vcmp.eq.s32.totalorder %v2837_v16, %v2960_v42 }
  0xcf   : > { %v1118_v45 = vadd.f32 %v1054_v3, %v906_v40  ;;  %v483_v47 = vsel %vm408_vm9, %v2957_v39, 0.0  ;;  %v1120_v48 = vadd.f32 %v1056_v44, %v908_v41  ;;  %v629_v49 = vsel %vm554_vm10, %v2963_v43, 0.0 }
  0xd0   : > { %vm766_vm12 = vcmp.eq.s32.totalorder %v2834_v15, %v2980_v56  ;;  %v631_v50 = vsel %vm556_vm11, %v2963_v43, 0.0  ;;  %v693_v52 = vadd.f32 %v629_v49, %v481_v46  ;;  %vm768_vm13 = vcmp.eq.s32.totalorder %v2837_v16, %v2980_v56 }
  0xd1   : > { %v841_v53 = vsel %vm766_vm12, %v2983_v57, 0.0  ;;  %v1175_v60 = vpack.c.bf16 %v1120_v48, %v1118_v45  ;;  %v695_v8 = vadd.f32 %v631_v50, %v483_v47  ;;  %v843_v10 = vsel %vm768_vm13, %v2983_v57, 0.0 }
  0xd2   : > { %vm978_vm14 = vcmp.eq.s32.totalorder %v2834_v15, %v2986_v62  ;;  %v905_v4 = vadd.f32 %v841_v53, %v693_v52  ;;  %vm980_vm15 = vcmp.eq.s32.totalorder %v2837_v16, %v2986_v62  ;;  %vm411_vm0 = vcmp.eq.s32.totalorder %v2840_v19, %v2904_v63  ;;  %v2334_v52 = vld [vmem:[#allocation7 + $0xc0] sm:$0xff]  }
  0xd3   : > { %v1053_v18 = vsel %vm978_vm14, %v2989_v7, 0.0  ;;  %1217 = vmatprep.subr.bf16.mxu0 %v1175_v60  ;;  %v907_v24 = vadd.f32 %v843_v10, %v695_v8  ;;  %v1055_v25 = vsel %vm980_vm15, %v2989_v7, 0.0  ;;  %vm413_vm1 = vcmp.eq.s32.totalorder %v2843_v20, %v2904_v63  ;;  %v2335_v53 = vld [vmem:[#allocation7 + $0x80] sm:$0xff]   ;;  %2162 = vmatprep.subr.bf16.mxu1 %v2334_v52  ;;  %v2347_v52 = vld [vmem:[#allocation7 + $0x98] sm:$0xff]  }
  0xd4   : > { %v486_v28 = vsel %vm411_vm0, %v2907_v0, 0.0  ;;  %v1117_v30 = vadd.f32 %v1053_v18, %v905_v4  ;;  %v488_v15 = vsel %vm413_vm1, %v2907_v0, 0.0  ;;  %vm559_vm2 = vcmp.eq.s32.totalorder %v2840_v19, %v2924_v23  ;;  %v2338_v18 = vld [vmem:[#allocation7 + $0xc8] sm:$0xff]   ;;  %2163 = vmatpush3.bf16.msra.mxu1 %v2335_v53 }
  0xd5   : > { %vm561_vm3 = vcmp.eq.s32.totalorder %v2843_v20, %v2924_v23  ;;  %v1119_v16 = vadd.f32 %v1055_v25, %v907_v24  ;;  %v634_v31 = vsel %vm559_vm2, %v2914_v9, 0.0  ;;  %vm771_vm4 = vcmp.eq.s32.totalorder %v2840_v19, %v2929_v26  ;;  %2164 = vmatprep.subr.bf16.mxu1 %v2338_v18 }
  0xd6   : > { %v636_v32 = vsel %vm561_vm3, %v2914_v9, 0.0  ;;  %v698_v13 = vadd.f32 %v634_v31, %v486_v28  ;;  %vm773_vm5 = vcmp.eq.s32.totalorder %v2843_v20, %v2929_v26  ;;  %v846_v5 = vsel %vm771_vm4, %v2932_v27, 0.0 }
  0xd7   : > { %v700_v14 = vadd.f32 %v636_v32, %v488_v15  ;;  %v1174_v6 = vpack.c.bf16 %v1119_v16, %v1117_v30  ;;  %v848_v11 = vsel %vm773_vm5, %v2932_v27, 0.0  ;;  %vm983_vm6 = vcmp.eq.s32.totalorder %v2840_v19, %v2950_v38  ;;  %v2339_v30 = vld [vmem:[#allocation7 + $0x88] sm:$0xff]  }
  0xd8   : > { %vm985_vm7 = vcmp.eq.s32.totalorder %v2843_v20, %v2950_v38  ;;  %v910_v12 = vadd.f32 %v846_v5, %v698_v13  ;;  %v1058_v35 = vsel %vm983_vm6, %v2939_v29, 0.0  ;;  %vm410_vm8 = vcmp.eq.s32.totalorder %v2840_v19, %v2917_v17  ;;  %v2342_v5 = vld [vmem:[#allocation7 + $0xd0] sm:$0xff]   ;;  %2165 = vmatpush3.bf16.msra.mxu1 %v2339_v30 }
  0xd9   : > { %v912_v2 = vadd.f32 %v848_v11, %v700_v14  ;;  %v1060_v36 = vsel %vm985_vm7, %v2939_v29, 0.0  ;;  %1218 = vmatpush1.bf16.msra.mxu0 %v1174_v6  ;;  %vm412_vm9 = vcmp.eq.s32.totalorder %v2843_v20, %v2917_v17  ;;  %vm558_vm10 = vcmp.eq.s32.totalorder %v2840_v19, %v2960_v42  ;;  %2166 = vmatprep.subr.bf16.mxu1 %v2342_v5 }
  0xda   : > { %vm560_vm11 = vcmp.eq.s32.totalorder %v2843_v20, %v2960_v42  ;;  %v1122_v37 = vadd.f32 %v1058_v35, %v910_v12  ;;  %v485_v41 = vsel %vm410_vm8, %v2957_v39, 0.0  ;;  %v487_v3 = vsel %vm412_vm9, %v2957_v39, 0.0  ;;  %v2343_v35 = vld [vmem:[#allocation7 + $0x90] sm:$0xff]  }
  0xdb   : > { %v1124_v40 = vadd.f32 %v1060_v36, %v912_v2  ;;  %v633_v44 = vsel %vm558_vm10, %v2963_v43, 0.0  ;;  %v635_v45 = vsel %vm560_vm11, %v2963_v43, 0.0  ;;  %vm770_vm12 = vcmp.eq.s32.totalorder %v2840_v19, %v2980_v56 }
  0xdc   : > { %vm772_vm13 = vcmp.eq.s32.totalorder %v2843_v20, %v2980_v56  ;;  %v697_v47 = vadd.f32 %v633_v44, %v485_v41  ;;  %v699_v48 = vadd.f32 %v635_v45, %v487_v3  ;;  %v845_v49 = vsel %vm770_vm12, %v2983_v57, 0.0  ;;  %v2346_v44 = vld [vmem:[#allocation7 + $0xd8] sm:$0xff]   ;;  %2167 = vmatpush3.bf16.msra.mxu1 %v2343_v35 }
  0xdd   : > { %v1177_v46 = vpack.c.bf16 %v1124_v40, %v1122_v37  ;;  %v847_v50 = vsel %vm772_vm13, %v2983_v57, 0.0  ;;  %vm982_vm14 = vcmp.eq.s32.totalorder %v2840_v19, %v2986_v62  ;;  %vm984_vm15 = vcmp.eq.s32.totalorder %v2843_v20, %v2986_v62  ;;  %2168 = vmatprep.subr.bf16.mxu1 %v2346_v44 }
  0xde   : > { %vm415_vm0 = vcmp.eq.s32.totalorder %v2846_v21, %v2904_v63  ;;  %v909_v60 = vadd.f32 %v845_v49, %v697_v47  ;;  %v911_v8 = vadd.f32 %v847_v50, %v699_v48  ;;  %v1057_v10 = vsel %vm982_vm14, %v2989_v7, 0.0 }
  0xdf   : > { %1219 = vmatprep.subr.bf16.mxu0 %v1177_v46  ;;  %v1059_v4 = vsel %vm984_vm15, %v2989_v7, 0.0  ;;  %vm417_vm1 = vcmp.eq.s32.totalorder %v2849_v22, %v2904_v63  ;;  %v490_v19 = vsel %vm415_vm0, %v2907_v0, 0.0  ;;  %vm563_vm2 = vcmp.eq.s32.totalorder %v2846_v21, %v2924_v23 }
  0xe0   : > { %vm565_vm3 = vcmp.eq.s32.totalorder %v2849_v22, %v2924_v23  ;;  %v1121_v20 = vadd.f32 %v1057_v10, %v909_v60  ;;  %v1123_v24 = vadd.f32 %v1059_v4, %v911_v8  ;;  %v492_v25 = vsel %vm417_vm1, %v2907_v0, 0.0  ;;  %v2350_v4 = vld [vmem:[#allocation7 + $0xe0] sm:$0xff]   ;;  %2169 = vmatpush3.bf16.msra.mxu1 %v2347_v52 }
  0xe1   : > { %v638_v28 = vsel %vm563_vm2, %v2914_v9, 0.0  ;;  %v640_v15 = vsel %vm565_vm3, %v2914_v9, 0.0  ;;  %vm775_vm4 = vcmp.eq.s32.totalorder %v2846_v21, %v2929_v26  ;;  %vm777_vm5 = vcmp.eq.s32.totalorder %v2849_v22, %v2929_v26  ;;  %2170 = vmatprep.subr.bf16.mxu1 %v2350_v4 }
  0xe2   : > { %v702_v16 = vadd.f32 %v638_v28, %v490_v19  ;;  %v1176_v31 = vpack.c.bf16 %v1123_v24, %v1121_v20  ;;  %v704_v32 = vadd.f32 %v640_v15, %v492_v25  ;;  %v850_v13 = vsel %vm775_vm4, %v2932_v27, 0.0  ;;  %v2351_v15 = vld [vmem:[#allocation7 + $0xa0] sm:$0xff]  }
  0xe3   : > { %v852_v14 = vsel %vm777_vm5, %v2932_v27, 0.0  ;;  %vm987_vm6 = vcmp.eq.s32.totalorder %v2846_v21, %v2950_v38  ;;  %vm989_vm7 = vcmp.eq.s32.totalorder %v2849_v22, %v2950_v38  ;;  %vm414_vm8 = vcmp.eq.s32.totalorder %v2846_v21, %v2917_v17 }
  0xe4   : > { %v914_v6 = vadd.f32 %v850_v13, %v702_v16  ;;  %1220 = vmatpush1.bf16.msra.mxu0 %v1176_v31  ;;  %v916_v11 = vadd.f32 %v852_v14, %v704_v32  ;;  %v1062_v12 = vsel %vm987_vm6, %v2939_v29, 0.0  ;;  %v1064_v2 = vsel %vm989_vm7, %v2939_v29, 0.0  ;;  %v2354_v32 = vld [vmem:[#allocation7 + $0xe8] sm:$0xff]   ;;  %2171 = vmatpush3.bf16.msra.mxu1 %v2351_v15 }
  0xe5   : > { %vm416_vm9 = vcmp.eq.s32.totalorder %v2849_v22, %v2917_v17  ;;  %v489_v37 = vsel %vm414_vm8, %v2957_v39, 0.0  ;;  %vm562_vm10 = vcmp.eq.s32.totalorder %v2846_v21, %v2960_v42  ;;  %vm564_vm11 = vcmp.eq.s32.totalorder %v2849_v22, %v2960_v42  ;;  %2172 = vmatprep.subr.bf16.mxu1 %v2354_v32 }
  0xe6   : > { %v1126_v36 = vadd.f32 %v1062_v12, %v914_v6  ;;  %v491_v40 = vsel %vm416_vm9, %v2957_v39, 0.0  ;;  %v1128_v41 = vadd.f32 %v1064_v2, %v916_v11  ;;  %v637_v3 = vsel %vm562_vm10, %v2963_v43, 0.0 }
  0xe7   : > { %vm774_vm12 = vcmp.eq.s32.totalorder %v2846_v21, %v2980_v56  ;;  %v639_v45 = vsel %vm564_vm11, %v2963_v43, 0.0  ;;  %v701_v46 = vadd.f32 %v637_v3, %v489_v37  ;;  %vm776_vm13 = vcmp.eq.s32.totalorder %v2849_v22, %v2980_v56 }
  0xe8   : > { %v849_v47 = vsel %vm774_vm12, %v2983_v57, 0.0  ;;  %v1179_v48 = vpack.c.bf16 %v1128_v41, %v1126_v36  ;;  %v703_v49 = vadd.f32 %v639_v45, %v491_v40  ;;  %v851_v50 = vsel %vm776_vm13, %v2983_v57, 0.0  ;;  %v2355_v36 = vld [vmem:[#allocation7 + $0xa8] sm:$0xff]   ;;  %v2358_v41 = vld [vmem:[#allocation7 + $0xf0] sm:$0xff]  }
  0xe9   : > { %vm986_vm14 = vcmp.eq.s32.totalorder %v2846_v21, %v2986_v62  ;;  %v913_v53 = vadd.f32 %v849_v47, %v701_v46  ;;  %vm988_vm15 = vcmp.eq.s32.totalorder %v2849_v22, %v2986_v62  ;;  %vm419_vm0 = vcmp.eq.s32.totalorder %v2852_v33, %v2904_v63  ;;  %2173 = vmatpush3.bf16.msra.mxu1 %v2355_v36 }
  0xea   : > { %v1061_v60 = vsel %vm986_vm14, %v2989_v7, 0.0  ;;  %1221 = vmatprep.subr.bf16.mxu0 %v1179_v48  ;;  %v915_v8 = vadd.f32 %v851_v50, %v703_v49  ;;  %v1063_v10 = vsel %vm988_vm15, %v2989_v7, 0.0  ;;  %vm421_vm1 = vcmp.eq.s32.totalorder %v2855_v34, %v2904_v63  ;;  %2174 = vmatprep.subr.bf16.mxu1 %v2358_v41 }
  0xeb   : > { %v494_v21 = vsel %vm419_vm0, %v2907_v0, 0.0  ;;  %v1125_v18 = vadd.f32 %v1061_v60, %v913_v53  ;;  %v496_v19 = vsel %vm421_vm1, %v2907_v0, 0.0  ;;  %vm567_vm2 = vcmp.eq.s32.totalorder %v2852_v33, %v2924_v23  ;;  %v2359_v53 = vld [vmem:[#allocation7 + $0xb0] sm:$0xff]  }
  0xec   : > { %vm569_vm3 = vcmp.eq.s32.totalorder %v2855_v34, %v2924_v23  ;;  %v1127_v22 = vadd.f32 %v1063_v10, %v915_v8  ;;  %v642_v20 = vsel %vm567_vm2, %v2914_v9, 0.0  ;;  %vm779_vm4 = vcmp.eq.s32.totalorder %v2852_v33, %v2929_v26 }
  0xed   : > { %v644_v24 = vsel %vm569_vm3, %v2914_v9, 0.0  ;;  %v706_v25 = vadd.f32 %v642_v20, %v494_v21  ;;  %vm781_vm5 = vcmp.eq.s32.totalorder %v2855_v34, %v2929_v26  ;;  %v854_v30 = vsel %vm779_vm4, %v2932_v27, 0.0  ;;  %2175 = vmatpush3.bf16.msra.mxu1 %v2359_v53 }
  0xee   : > { %v708_v28 = vadd.f32 %v644_v24, %v496_v19  ;;  %v1178_v16 = vpack.c.bf16 %v1127_v22, %v1125_v18  ;;  %v856_v31 = vsel %vm781_vm5, %v2932_v27, 0.0  ;;  %vm991_vm6 = vcmp.eq.s32.totalorder %v2852_v33, %v2950_v38 }
  0xef   : > { %vm993_vm7 = vcmp.eq.s32.totalorder %v2855_v34, %v2950_v38  ;;  %v918_v13 = vadd.f32 %v854_v30, %v706_v25  ;;  %v1066_v5 = vsel %vm991_vm6, %v2939_v29, 0.0  ;;  %vm418_vm8 = vcmp.eq.s32.totalorder %v2852_v33, %v2917_v17 }
  0xf0   : > { %v920_v14 = vadd.f32 %v856_v31, %v708_v28  ;;  %v1068_v6 = vsel %vm993_vm7, %v2939_v29, 0.0  ;;  %1222 = vmatpush1.bf16.msra.mxu0 %v1178_v16  ;;  %vm420_vm9 = vcmp.eq.s32.totalorder %v2855_v34, %v2917_v17  ;;  %vm566_vm10 = vcmp.eq.s32.totalorder %v2852_v33, %v2960_v42 }
  0xf1   : > { %vm568_vm11 = vcmp.eq.s32.totalorder %v2855_v34, %v2960_v42  ;;  %v1130_v11 = vadd.f32 %v1066_v5, %v918_v13  ;;  %v493_v2 = vsel %vm418_vm8, %v2957_v39, 0.0  ;;  %v495_v35 = vsel %vm420_vm9, %v2957_v39, 0.0 }
  0xf2   : > { %v1132_v12 = vadd.f32 %v1068_v6, %v920_v14  ;;  %v641_v37 = vsel %vm566_vm10, %v2963_v43, 0.0  ;;  %v643_v40 = vsel %vm568_vm11, %v2963_v43, 0.0  ;;  %vm778_vm12 = vcmp.eq.s32.totalorder %v2852_v33, %v2980_v56 }
  0xf3   : > { %vm780_vm13 = vcmp.eq.s32.totalorder %v2855_v34, %v2980_v56  ;;  %v705_v44 = vadd.f32 %v641_v37, %v493_v2  ;;  %v707_v45 = vadd.f32 %v643_v40, %v495_v35  ;;  %v853_v46 = vsel %vm778_vm12, %v2983_v57, 0.0 }
  0xf4   : > { %v1181_v3 = vpack.c.bf16 %v1132_v12, %v1130_v11  ;;  %v855_v47 = vsel %vm780_vm13, %v2983_v57, 0.0  ;;  %vm990_vm14 = vcmp.eq.s32.totalorder %v2852_v33, %v2986_v62  ;;  %vm992_vm15 = vcmp.eq.s32.totalorder %v2855_v34, %v2986_v62 }
  0xf5   : > { %vm423_vm0 = vcmp.eq.s32.totalorder %v2870_v51, %v2904_v63  ;;  %v917_v48 = vadd.f32 %v853_v46, %v705_v44  ;;  %v919_v49 = vadd.f32 %v855_v47, %v707_v45  ;;  %v1065_v50 = vsel %vm990_vm14, %v2989_v7, 0.0 }
  0xf6   : > { %1223 = vmatprep.subr.bf16.mxu0 %v1181_v3  ;;  %v1067_v52 = vsel %vm992_vm15, %v2989_v7, 0.0  ;;  %vm425_vm1 = vcmp.eq.s32.totalorder %v2877_v54, %v2904_v63  ;;  %v498_v33 = vsel %vm423_vm0, %v2907_v0, 0.0  ;;  %vm571_vm2 = vcmp.eq.s32.totalorder %v2870_v51, %v2924_v23 }
  0xf7   : > { %vm573_vm3 = vcmp.eq.s32.totalorder %v2877_v54, %v2924_v23  ;;  %v1129_v34 = vadd.f32 %v1065_v50, %v917_v48  ;;  %v1131_v60 = vadd.f32 %v1067_v52, %v919_v49  ;;  %v500_v8 = vsel %vm425_vm1, %v2907_v0, 0.0 }
  0xf8   : > { %v646_v10 = vsel %vm571_vm2, %v2914_v9, 0.0  ;;  %v648_v21 = vsel %vm573_vm3, %v2914_v9, 0.0  ;;  %vm783_vm4 = vcmp.eq.s32.totalorder %v2870_v51, %v2929_v26  ;;  %vm785_vm5 = vcmp.eq.s32.totalorder %v2877_v54, %v2929_v26 }
  0xf9   : > { %v710_v4 = vadd.f32 %v646_v10, %v498_v33  ;;  %v1180_v18 = vpack.c.bf16 %v1131_v60, %v1129_v34  ;;  %v712_v19 = vadd.f32 %v648_v21, %v500_v8  ;;  %v858_v22 = vsel %vm783_vm4, %v2932_v27, 0.0 }
  0xfa   : > { %v860_v20 = vsel %vm785_vm5, %v2932_v27, 0.0  ;;  %vm995_vm6 = vcmp.eq.s32.totalorder %v2870_v51, %v2950_v38  ;;  %vm997_vm7 = vcmp.eq.s32.totalorder %v2877_v54, %v2950_v38  ;;  %vm422_vm8 = vcmp.eq.s32.totalorder %v2870_v51, %v2917_v17 }
  0xfb   : > { %v922_v24 = vadd.f32 %v858_v22, %v710_v4  ;;  %1224 = vmatpush1.bf16.msra.mxu0 %v1180_v18  ;;  %v924_v25 = vadd.f32 %v860_v20, %v712_v19  ;;  %v1070_v28 = vsel %vm995_vm6, %v2939_v29, 0.0  ;;  %v1072_v30 = vsel %vm997_vm7, %v2939_v29, 0.0 }
  0xfc   : > { %vm424_vm9 = vcmp.eq.s32.totalorder %v2877_v54, %v2917_v17  ;;  %v497_v16 = vsel %vm422_vm8, %v2957_v39, 0.0  ;;  %vm570_vm10 = vcmp.eq.s32.totalorder %v2870_v51, %v2960_v42  ;;  %vm572_vm11 = vcmp.eq.s32.totalorder %v2877_v54, %v2960_v42 }
  0xfd   : > { %v1134_v15 = vadd.f32 %v1070_v28, %v922_v24  ;;  %v499_v31 = vsel %vm424_vm9, %v2957_v39, 0.0  ;;  %v1136_v32 = vadd.f32 %v1072_v30, %v924_v25  ;;  %v645_v13 = vsel %vm570_vm10, %v2963_v43, 0.0 }
  0xfe   : > { %vm782_vm12 = vcmp.eq.s32.totalorder %v2870_v51, %v2980_v56  ;;  %v647_v14 = vsel %vm572_vm11, %v2963_v43, 0.0  ;;  %v709_v5 = vadd.f32 %v645_v13, %v497_v16  ;;  %vm784_vm13 = vcmp.eq.s32.totalorder %v2877_v54, %v2980_v56 }
  0xff   : > { %v857_v6 = vsel %vm782_vm12, %v2983_v57, 0.0  ;;  %v1183_v11 = vpack.c.bf16 %v1136_v32, %v1134_v15  ;;  %v711_v12 = vadd.f32 %v647_v14, %v499_v31  ;;  %v859_v2 = vsel %vm784_vm13, %v2983_v57, 0.0 }
 0x100   : > { %vm994_vm14 = vcmp.eq.s32.totalorder %v2870_v51, %v2986_v62  ;;  %v921_v35 = vadd.f32 %v857_v6, %v709_v5  ;;  %vm996_vm15 = vcmp.eq.s32.totalorder %v2877_v54, %v2986_v62  ;;  %vm427_vm0 = vcmp.eq.s32.totalorder %v2880_v55, %v2904_v63 }
 0x101   : > { %v1069_v36 = vsel %vm994_vm14, %v2989_v7, 0.0  ;;  %1225 = vmatprep.subr.bf16.mxu0 %v1183_v11  ;;  %v923_v37 = vadd.f32 %v859_v2, %v711_v12  ;;  %v1071_v40 = vsel %vm996_vm15, %v2989_v7, 0.0  ;;  %vm429_vm1 = vcmp.eq.s32.totalorder %v2887_v58, %v2904_v63 }
 0x102   : > { %v502_v41 = vsel %vm427_vm0, %v2907_v0, 0.0  ;;  %v1133_v3 = vadd.f32 %v1069_v36, %v921_v35  ;;  %v504_v51 = vsel %vm429_vm1, %v2907_v0, 0.0  ;;  %vm575_vm2 = vcmp.eq.s32.totalorder %v2880_v55, %v2924_v23 }
 0x103   : > { %vm577_vm3 = vcmp.eq.s32.totalorder %v2887_v58, %v2924_v23  ;;  %v1135_v54 = vadd.f32 %v1071_v40, %v923_v37  ;;  %v650_v44 = vsel %vm575_vm2, %v2914_v9, 0.0  ;;  %vm787_vm4 = vcmp.eq.s32.totalorder %v2880_v55, %v2929_v26 }
 0x104   : > { %v652_v45 = vsel %vm577_vm3, %v2914_v9, 0.0  ;;  %v714_v46 = vadd.f32 %v650_v44, %v502_v41  ;;  %vm789_vm5 = vcmp.eq.s32.totalorder %v2887_v58, %v2929_v26  ;;  %v862_v48 = vsel %vm787_vm4, %v2932_v27, 0.0 }
 0x105   : > { %v716_v47 = vadd.f32 %v652_v45, %v504_v51  ;;  %v1182_v49 = vpack.c.bf16 %v1135_v54, %v1133_v3  ;;  %v864_v50 = vsel %vm789_vm5, %v2932_v27, 0.0  ;;  %vm999_vm6 = vcmp.eq.s32.totalorder %v2880_v55, %v2950_v38 }
 0x106   : > { %vm1001_vm7 = vcmp.eq.s32.totalorder %v2887_v58, %v2950_v38  ;;  %v926_v52 = vadd.f32 %v862_v48, %v714_v46  ;;  %v1074_v33 = vsel %vm999_vm6, %v2939_v29, 0.0  ;;  %vm426_vm8 = vcmp.eq.s32.totalorder %v2880_v55, %v2917_v17 }
 0x107   : > { %v928_v53 = vadd.f32 %v864_v50, %v716_v47  ;;  %v1076_v34 = vsel %vm1001_vm7, %v2939_v29, 0.0  ;;  %1226 = vmatpush1.bf16.msra.mxu0 %v1182_v49  ;;  %vm428_vm9 = vcmp.eq.s32.totalorder %v2887_v58, %v2917_v17  ;;  %vm574_vm10 = vcmp.eq.s32.totalorder %v2880_v55, %v2960_v42 }
 0x108   : > { %vm576_vm11 = vcmp.eq.s32.totalorder %v2887_v58, %v2960_v42  ;;  %v1138_v60 = vadd.f32 %v1074_v33, %v926_v52  ;;  %v501_v10 = vsel %vm426_vm8, %v2957_v39, 0.0  ;;  %v503_v21 = vsel %vm428_vm9, %v2957_v39, 0.0 }
 0x109   : > { %v1140_v8 = vadd.f32 %v1076_v34, %v928_v53  ;;  %v649_v4 = vsel %vm574_vm10, %v2963_v43, 0.0  ;;  %v651_v18 = vsel %vm576_vm11, %v2963_v43, 0.0  ;;  %vm786_vm12 = vcmp.eq.s32.totalorder %v2880_v55, %v2980_v56 }
 0x10a   : > { %vm788_vm13 = vcmp.eq.s32.totalorder %v2887_v58, %v2980_v56  ;;  %v713_v22 = vadd.f32 %v649_v4, %v501_v10  ;;  %v715_v20 = vadd.f32 %v651_v18, %v503_v21  ;;  %v861_v24 = vsel %vm786_vm12, %v2983_v57, 0.0 }
 0x10b   : > { %v1185_v19 = vpack.c.bf16 %v1140_v8, %v1138_v60  ;;  %v863_v25 = vsel %vm788_vm13, %v2983_v57, 0.0  ;;  %vm998_vm14 = vcmp.eq.s32.totalorder %v2880_v55, %v2986_v62  ;;  %vm1000_vm15 = vcmp.eq.s32.totalorder %v2887_v58, %v2986_v62 }
 0x10c   : > { %vm431_vm0 = vcmp.eq.s32.totalorder %v2890_v59, %v2904_v63  ;;  %v925_v28 = vadd.f32 %v861_v24, %v713_v22  ;;  %v927_v30 = vadd.f32 %v863_v25, %v715_v20  ;;  %v1073_v15 = vsel %vm998_vm14, %v2989_v7, 0.0 }
 0x10d   : > { %1227 = vmatprep.subr.bf16.mxu0 %v1185_v19  ;;  %v1075_v16 = vsel %vm1000_vm15, %v2989_v7, 0.0  ;;  %vm433_vm1 = vcmp.eq.s32.totalorder %v2897_v61, %v2904_v63  ;;  %v506_v31 = vsel %vm431_vm0, %v2907_v0, 0.0  ;;  %vm579_vm2 = vcmp.eq.s32.totalorder %v2890_v59, %v2924_v23 }
 0x10e   : > { %vm581_vm3 = vcmp.eq.s32.totalorder %v2897_v61, %v2924_v23  ;;  %v1137_v55 = vadd.f32 %v1073_v15, %v925_v28  ;;  %v1139_v58 = vadd.f32 %v1075_v16, %v927_v30  ;;  %v508_v32 = vsel %vm433_vm1, %v2907_v0, 0.0 }
 0x10f   : > { %v654_v13 = vsel %vm579_vm2, %v2914_v9, 0.0  ;;  %v656_v14 = vsel %vm581_vm3, %v2914_v9, 0.0  ;;  %vm791_vm4 = vcmp.eq.s32.totalorder %v2890_v59, %v2929_v26  ;;  %vm793_vm5 = vcmp.eq.s32.totalorder %v2897_v61, %v2929_v26 }
 0x110   : > { %v718_v5 = vadd.f32 %v654_v13, %v506_v31  ;;  %v1184_v6 = vpack.c.bf16 %v1139_v58, %v1137_v55  ;;  %v720_v11 = vadd.f32 %v656_v14, %v508_v32  ;;  %v866_v12 = vsel %vm791_vm4, %v2932_v27, 0.0 }
 0x111   : > { %v868_v2 = vsel %vm793_vm5, %v2932_v27, 0.0  ;;  %vm1003_vm6 = vcmp.eq.s32.totalorder %v2890_v59, %v2950_v38  ;;  %vm1005_vm7 = vcmp.eq.s32.totalorder %v2897_v61, %v2950_v38  ;;  %vm430_vm8 = vcmp.eq.s32.totalorder %v2890_v59, %v2917_v17 }
 0x112   : > { %v930_v35 = vadd.f32 %v866_v12, %v718_v5  ;;  %1228 = vmatpush1.bf16.msra.mxu0 %v1184_v6  ;;  %v932_v36 = vadd.f32 %v868_v2, %v720_v11  ;;  %v1078_v37 = vsel %vm1003_vm6, %v2939_v29, 0.0  ;;  %v1080_v40 = vsel %vm1005_vm7, %v2939_v29, 0.0 }
 0x113   : > { %vm432_vm9 = vcmp.eq.s32.totalorder %v2897_v61, %v2917_v17  ;;  %v505_v3 = vsel %vm430_vm8, %v2957_v39, 0.0  ;;  %vm578_vm10 = vcmp.eq.s32.totalorder %v2890_v59, %v2960_v42  ;;  %vm580_vm11 = vcmp.eq.s32.totalorder %v2897_v61, %v2960_v42 }
 0x114   : > { %v1142_v41 = vadd.f32 %v1078_v37, %v930_v35  ;;  %v507_v51 = vsel %vm432_vm9, %v2957_v39, 0.0  ;;  %v1144_v54 = vadd.f32 %v1080_v40, %v932_v36  ;;  %v653_v44 = vsel %vm578_vm10, %v2963_v43, 0.0 }
 0x115   : > { %vm790_vm12 = vcmp.eq.s32.totalorder %v2890_v59, %v2980_v56  ;;  %v655_v45 = vsel %vm580_vm11, %v2963_v43, 0.0  ;;  %v717_v46 = vadd.f32 %v653_v44, %v505_v3  ;;  %vm792_vm13 = vcmp.eq.s32.totalorder %v2897_v61, %v2980_v56 }
 0x116   : > { %v865_v47 = vsel %vm790_vm12, %v2983_v57, 0.0  ;;  %v1187_v48 = vpack.c.bf16 %v1144_v54, %v1142_v41  ;;  %v719_v49 = vadd.f32 %v655_v45, %v507_v51  ;;  %v867_v50 = vsel %vm792_vm13, %v2983_v57, 0.0 }
 0x117   : > { %vm1002_vm14 = vcmp.eq.s32.totalorder %v2890_v59, %v2986_v62  ;;  %v929_v52 = vadd.f32 %v865_v47, %v717_v46  ;;  %vm1004_vm15 = vcmp.eq.s32.totalorder %v2897_v61, %v2986_v62  ;;  %v321_v33 = vadd.s32 176, %v2804_v1 }
 0x118   : > { %v1077_v53 = vsel %vm1002_vm14, %v2989_v7, 0.0  ;;  %1229 = vmatprep.subr.bf16.mxu0 %v1187_v48  ;;  %v931_v34 = vadd.f32 %v867_v50, %v719_v49  ;;  %v1079_v60 = vsel %vm1004_vm15, %v2989_v7, 0.0  ;;  %v322_v8 = vadd.s32 184, %v2804_v1 }
 0x119   : > { %v3486_v10 = vadd.s32 192, %v2804_v1  ;;  %v1141_v21 = vadd.f32 %v1077_v53, %v929_v52  ;;  %vm435_vm0 = vcmp.eq.s32.totalorder %v321_v33, %v2904_v63  ;;  %vm583_vm1 = vcmp.eq.s32.totalorder %v321_v33, %v2924_v23 }
 0x11a   : > { %vm795_vm2 = vcmp.eq.s32.totalorder %v321_v33, %v2929_v26  ;;  %v1143_v59 = vadd.f32 %v1079_v60, %v931_v34  ;;  %vm437_vm3 = vcmp.eq.s32.totalorder %v322_v8, %v2904_v63  ;;  %v510_v61 = vsel %vm435_vm0, %v2907_v0, 0.0 }
 0x11b   : > { %vm585_vm4 = vcmp.eq.s32.totalorder %v322_v8, %v2924_v23  ;;  %v512_v4 = vsel %vm437_vm3, %v2907_v0, 0.0  ;;  %v658_v18 = vsel %vm583_vm1, %v2914_v9, 0.0  ;;  %vm797_vm5 = vcmp.eq.s32.totalorder %v322_v8, %v2929_v26 }
 0x11c   : > { %v660_v19 = vsel %vm585_vm4, %v2914_v9, 0.0  ;;  %v1186_v22 = vpack.c.bf16 %v1143_v59, %v1141_v21  ;;  %v722_v20 = vadd.f32 %v658_v18, %v510_v61  ;;  %v870_v25 = vsel %vm795_vm2, %v2932_v27, 0.0 }
 0x11d   : > { %v724_v24 = vadd.f32 %v660_v19, %v512_v4  ;;  %v872_v28 = vsel %vm797_vm5, %v2932_v27, 0.0  ;;  %vm1007_vm6 = vcmp.eq.s32.totalorder %v321_v33, %v2950_v38  ;;  %vm1009_vm7 = vcmp.eq.s32.totalorder %v322_v8, %v2950_v38 }
 0x11e   : > { %vm434_vm8 = vcmp.eq.s32.totalorder %v321_v33, %v2917_v17  ;;  %1230 = vmatpush1.bf16.msra.mxu0 %v1186_v22  ;;  %v934_v30 = vadd.f32 %v870_v25, %v722_v20  ;;  %v1082_v16 = vsel %vm1007_vm6, %v2939_v29, 0.0  ;;  %v1084_v31 = vsel %vm1009_vm7, %v2939_v29, 0.0 }
 0x11f   : > { %v936_v15 = vadd.f32 %v872_v28, %v724_v24  ;;  %vm436_vm9 = vcmp.eq.s32.totalorder %v322_v8, %v2917_v17  ;;  %v509_v55 = vsel %vm434_vm8, %v2957_v39, 0.0  ;;  %vm582_vm10 = vcmp.eq.s32.totalorder %v321_v33, %v2960_v42 }
 0x120   : > { %vm584_vm11 = vcmp.eq.s32.totalorder %v322_v8, %v2960_v42  ;;  %v1146_v58 = vadd.f32 %v1082_v16, %v934_v30  ;;  %v511_v13 = vsel %vm436_vm9, %v2957_v39, 0.0  ;;  %v657_v14 = vsel %vm582_vm10, %v2963_v43, 0.0 }
 0x121   : > { %v1148_v32 = vadd.f32 %v1084_v31, %v936_v15  ;;  %v659_v5 = vsel %vm584_vm11, %v2963_v43, 0.0  ;;  %v721_v6 = vadd.f32 %v657_v14, %v509_v55  ;;  %vm794_vm12 = vcmp.eq.s32.totalorder %v321_v33, %v2980_v56 }
 0x122   : > { %vm796_vm13 = vcmp.eq.s32.totalorder %v322_v8, %v2980_v56  ;;  %v723_v12 = vadd.f32 %v659_v5, %v511_v13  ;;  %v869_v2 = vsel %vm794_vm12, %v2983_v57, 0.0  ;;  %vm1006_vm14 = vcmp.eq.s32.totalorder %v321_v33, %v2986_v62 }
 0x123   : > { %v1189_v11 = vpack.c.bf16 %v1148_v32, %v1146_v58  ;;  %v871_v35 = vsel %vm796_vm13, %v2983_v57, 0.0  ;;  %v933_v36 = vadd.f32 %v869_v2, %v721_v6  ;;  %vm1008_vm15 = vcmp.eq.s32.totalorder %v322_v8, %v2986_v62 }
 0x124   : > { %v324_v37 = vadd.s32 200, %v2804_v1  ;;  %v935_v40 = vadd.f32 %v871_v35, %v723_v12  ;;  %v1081_v41 = vsel %vm1006_vm14, %v2989_v7, 0.0  ;;  %v1083_v3 = vsel %vm1008_vm15, %v2989_v7, 0.0 }
 0x125   : > { %1231 = vmatprep.subr.bf16.mxu0 %v1189_v11  ;;  %vm439_vm0 = vcmp.eq.s32.totalorder %v3486_v10, %v2904_v63  ;;  %v1145_v51 = vadd.f32 %v1081_v41, %v933_v36  ;;  %vm587_vm2 = vcmp.eq.s32.totalorder %v3486_v10, %v2924_v23  ;;  %vm799_vm4 = vcmp.eq.s32.totalorder %v3486_v10, %v2929_v26 }
 0x126   : > { %vm441_vm1 = vcmp.eq.s32.totalorder %v324_v37, %v2904_v63  ;;  %v514_v54 = vsel %vm439_vm0, %v2907_v0, 0.0  ;;  %v1147_v44 = vadd.f32 %v1083_v3, %v935_v40  ;;  %vm589_vm3 = vcmp.eq.s32.totalorder %v324_v37, %v2924_v23 }
 0x127   : > { %v516_v45 = vsel %vm441_vm1, %v2907_v0, 0.0  ;;  %v662_v46 = vsel %vm587_vm2, %v2914_v9, 0.0  ;;  %v664_v47 = vsel %vm589_vm3, %v2914_v9, 0.0  ;;  %vm801_vm5 = vcmp.eq.s32.totalorder %v324_v37, %v2929_v26 }
 0x128   : > { %v726_v48 = vadd.f32 %v662_v46, %v514_v54  ;;  %v1188_v49 = vpack.c.bf16 %v1147_v44, %v1145_v51  ;;  %v728_v50 = vadd.f32 %v664_v47, %v516_v45  ;;  %v874_v52 = vsel %vm799_vm4, %v2932_v27, 0.0 }
 0x129   : > { %v876_v53 = vsel %vm801_vm5, %v2932_v27, 0.0  ;;  %vm1011_vm6 = vcmp.eq.s32.totalorder %v3486_v10, %v2950_v38  ;;  %vm1013_vm7 = vcmp.eq.s32.totalorder %v324_v37, %v2950_v38  ;;  %vm438_vm8 = vcmp.eq.s32.totalorder %v3486_v10, %v2917_v17 }
 0x12a   : > { %v938_v33 = vadd.f32 %v874_v52, %v726_v48  ;;  %1232 = vmatpush1.bf16.msra.mxu0 %v1188_v49  ;;  %v940_v34 = vadd.f32 %v876_v53, %v728_v50  ;;  %v1086_v60 = vsel %vm1011_vm6, %v2939_v29, 0.0  ;;  %v1088_v8 = vsel %vm1013_vm7, %v2939_v29, 0.0 }
 0x12b   : > { %vm440_vm9 = vcmp.eq.s32.totalorder %v324_v37, %v2917_v17  ;;  %v513_v59 = vsel %vm438_vm8, %v2957_v39, 0.0  ;;  %vm586_vm10 = vcmp.eq.s32.totalorder %v3486_v10, %v2960_v42  ;;  %vm588_vm11 = vcmp.eq.s32.totalorder %v324_v37, %v2960_v42 }
 0x12c   : > { %v1150_v21 = vadd.f32 %v1086_v60, %v938_v33  ;;  %v515_v61 = vsel %vm440_vm9, %v2957_v39, 0.0  ;;  %v1152_v4 = vadd.f32 %v1088_v8, %v940_v34  ;;  %v661_v18 = vsel %vm586_vm10, %v2963_v43, 0.0 }
 0x12d   : > { %vm798_vm12 = vcmp.eq.s32.totalorder %v3486_v10, %v2980_v56  ;;  %v663_v19 = vsel %vm588_vm11, %v2963_v43, 0.0  ;;  %v725_v22 = vadd.f32 %v661_v18, %v513_v59  ;;  %vm800_vm13 = vcmp.eq.s32.totalorder %v324_v37, %v2980_v56 }
 0x12e   : > { %v873_v20 = vsel %vm798_vm12, %v2983_v57, 0.0  ;;  %v1191_v24 = vpack.c.bf16 %v1152_v4, %v1150_v21  ;;  %v727_v25 = vadd.f32 %v663_v19, %v515_v61  ;;  %v875_v28 = vsel %vm800_vm13, %v2983_v57, 0.0 }
 0x12f   : > { %vm1010_vm14 = vcmp.eq.s32.totalorder %v3486_v10, %v2986_v62  ;;  %v937_v30 = vadd.f32 %v873_v20, %v725_v22  ;;  %vm1012_vm15 = vcmp.eq.s32.totalorder %v324_v37, %v2986_v62  ;;  %v325_v16 = vadd.s32 208, %v2804_v1 }
 0x130   : > { %v1085_v15 = vsel %vm1010_vm14, %v2989_v7, 0.0  ;;  %1233 = vmatprep.subr.bf16.mxu0 %v1191_v24  ;;  %v939_v31 = vadd.f32 %v875_v28, %v727_v25  ;;  %v1087_v55 = vsel %vm1012_vm15, %v2989_v7, 0.0  ;;  %v326_v58 = vadd.s32 216, %v2804_v1 }
 0x131   : > { %v3564_v32 = vadd.s32 224, %v2804_v1  ;;  %v1149_v13 = vadd.f32 %v1085_v15, %v937_v30  ;;  %vm443_vm0 = vcmp.eq.s32.totalorder %v325_v16, %v2904_v63  ;;  %vm591_vm1 = vcmp.eq.s32.totalorder %v325_v16, %v2924_v23 }
 0x132   : > { %vm803_vm2 = vcmp.eq.s32.totalorder %v325_v16, %v2929_v26  ;;  %v1151_v10 = vadd.f32 %v1087_v55, %v939_v31  ;;  %vm445_vm3 = vcmp.eq.s32.totalorder %v326_v58, %v2904_v63  ;;  %v518_v14 = vsel %vm443_vm0, %v2907_v0, 0.0 }
 0x133   : > { %vm593_vm4 = vcmp.eq.s32.totalorder %v326_v58, %v2924_v23  ;;  %v520_v5 = vsel %vm445_vm3, %v2907_v0, 0.0  ;;  %v666_v6 = vsel %vm591_vm1, %v2914_v9, 0.0  ;;  %vm805_vm5 = vcmp.eq.s32.totalorder %v326_v58, %v2929_v26 }
 0x134   : > { %v668_v11 = vsel %vm593_vm4, %v2914_v9, 0.0  ;;  %v1190_v12 = vpack.c.bf16 %v1151_v10, %v1149_v13  ;;  %v730_v2 = vadd.f32 %v666_v6, %v518_v14  ;;  %v878_v36 = vsel %vm803_vm2, %v2932_v27, 0.0 }
 0x135   : > { %v732_v35 = vadd.f32 %v668_v11, %v520_v5  ;;  %v880_v37 = vsel %vm805_vm5, %v2932_v27, 0.0  ;;  %vm1015_vm6 = vcmp.eq.s32.totalorder %v325_v16, %v2950_v38  ;;  %vm1017_vm7 = vcmp.eq.s32.totalorder %v326_v58, %v2950_v38 }
 0x136   : > { %vm442_vm8 = vcmp.eq.s32.totalorder %v325_v16, %v2917_v17  ;;  %1234 = vmatpush1.bf16.msra.mxu0 %v1190_v12  ;;  %v942_v40 = vadd.f32 %v878_v36, %v730_v2  ;;  %v1090_v3 = vsel %vm1015_vm6, %v2939_v29, 0.0  ;;  %v1092_v51 = vsel %vm1017_vm7, %v2939_v29, 0.0 }
 0x137   : > { %v944_v41 = vadd.f32 %v880_v37, %v732_v35  ;;  %vm444_vm9 = vcmp.eq.s32.totalorder %v326_v58, %v2917_v17  ;;  %v517_v54 = vsel %vm442_vm8, %v2957_v39, 0.0  ;;  %vm590_vm10 = vcmp.eq.s32.totalorder %v325_v16, %v2960_v42  ;;  %v3634_v35 = vld.sshfl [vmem:[%s2794_s25] sm:$0x33 pattern:$0x76325410] }
 0x138   : > { %vm592_vm11 = vcmp.eq.s32.totalorder %v326_v58, %v2960_v42  ;;  %v1154_v44 = vadd.f32 %v1090_v3, %v942_v40  ;;  %v519_v46 = vsel %vm444_vm9, %v2957_v39, 0.0  ;;  %v665_v47 = vsel %vm590_vm10, %v2963_v43, 0.0 }
 0x139   : > { %v1156_v45 = vadd.f32 %v1092_v51, %v944_v41  ;;  %v667_v48 = vsel %vm592_vm11, %v2963_v43, 0.0  ;;  %v729_v49 = vadd.f32 %v665_v47, %v517_v54  ;;  %vm802_vm12 = vcmp.eq.s32.totalorder %v325_v16, %v2980_v56 }
 0x13a   : > { %vm804_vm13 = vcmp.eq.s32.totalorder %v326_v58, %v2980_v56  ;;  %v731_v52 = vadd.f32 %v667_v48, %v519_v46  ;;  %v877_v53 = vsel %vm802_vm12, %v2983_v57, 0.0  ;;  %vm1014_vm14 = vcmp.eq.s32.totalorder %v325_v16, %v2986_v62 }
 0x13b   : > { %v1193_v50 = vpack.c.bf16 %v1156_v45, %v1154_v44  ;;  %v879_v33 = vsel %vm804_vm13, %v2983_v57, 0.0  ;;  %v941_v34 = vadd.f32 %v877_v53, %v729_v49  ;;  %vm1016_vm15 = vcmp.eq.s32.totalorder %v326_v58, %v2986_v62 }
 0x13c   : > { %v328_v60 = vadd.s32 232, %v2804_v1  ;;  %v943_v8 = vadd.f32 %v879_v33, %v731_v52  ;;  %v1089_v21 = vsel %vm1014_vm14, %v2989_v7, 0.0  ;;  %v1091_v59 = vsel %vm1016_vm15, %v2989_v7, 0.0 }
 0x13d   : > { %1235 = vmatprep.subr.bf16.mxu0 %v1193_v50  ;;  %vm447_vm0 = vcmp.eq.s32.totalorder %v3564_v32, %v2904_v63  ;;  %v1153_v61 = vadd.f32 %v1089_v21, %v941_v34  ;;  %vm595_vm2 = vcmp.eq.s32.totalorder %v3564_v32, %v2924_v23  ;;  %vm807_vm4 = vcmp.eq.s32.totalorder %v3564_v32, %v2929_v26 }
 0x13e   : > { %vm449_vm1 = vcmp.eq.s32.totalorder %v328_v60, %v2904_v63  ;;  %v522_v4 = vsel %vm447_vm0, %v2907_v0, 0.0  ;;  %v1155_v18 = vadd.f32 %v1091_v59, %v943_v8  ;;  %vm597_vm3 = vcmp.eq.s32.totalorder %v328_v60, %v2924_v23 }
 0x13f   : > { %v524_v19 = vsel %vm449_vm1, %v2907_v0, 0.0  ;;  %v670_v22 = vsel %vm595_vm2, %v2914_v9, 0.0  ;;  %v672_v20 = vsel %vm597_vm3, %v2914_v9, 0.0  ;;  %vm809_vm5 = vcmp.eq.s32.totalorder %v328_v60, %v2929_v26 }
 0x140   : > { %v734_v24 = vadd.f32 %v670_v22, %v522_v4  ;;  %v1192_v25 = vpack.c.bf16 %v1155_v18, %v1153_v61  ;;  %v736_v28 = vadd.f32 %v672_v20, %v524_v19  ;;  %v882_v30 = vsel %vm807_vm4, %v2932_v27, 0.0 }
 0x141   : > { %v884_v15 = vsel %vm809_vm5, %v2932_v27, 0.0  ;;  %vm1019_vm6 = vcmp.eq.s32.totalorder %v3564_v32, %v2950_v38  ;;  %vm1021_vm7 = vcmp.eq.s32.totalorder %v328_v60, %v2950_v38  ;;  %vm446_vm8 = vcmp.eq.s32.totalorder %v3564_v32, %v2917_v17 }
 0x142   : > { %v946_v16 = vadd.f32 %v882_v30, %v734_v24  ;;  %1236 = vmatpush1.bf16.msra.mxu0 %v1192_v25  ;;  %v948_v31 = vadd.f32 %v884_v15, %v736_v28  ;;  %v1094_v55 = vsel %vm1019_vm6, %v2939_v29, 0.0  ;;  %v1096_v58 = vsel %vm1021_vm7, %v2939_v29, 0.0  ;;  %v2337_v25 = vld [vmem:[#allocation7 + $0x100] sm:$0xff]   ;;  %v2340_v28 = vld [vmem:[#allocation7 + $0x148] sm:$0xff]   ;;  %v2345_v30 = vld [vmem:[#allocation7 + $0x110] sm:$0xff]  }
 0x143   : > { %vm448_vm9 = vcmp.eq.s32.totalorder %v328_v60, %v2917_v17  ;;  %v521_v10 = vsel %vm446_vm8, %v2957_v39, 0.0  ;;  %vm594_vm10 = vcmp.eq.s32.totalorder %v3564_v32, %v2960_v42  ;;  %vm596_vm11 = vcmp.eq.s32.totalorder %v328_v60, %v2960_v42  ;;  %v2348_v15 = vld [vmem:[#allocation7 + $0x158] sm:$0xff]  }
 0x144   : > { %v1158_v13 = vadd.f32 %v1094_v55, %v946_v16  ;;  %v523_v14 = vsel %vm448_vm9, %v2957_v39, 0.0  ;;  %v1160_v5 = vadd.f32 %v1096_v58, %v948_v31  ;;  %v669_v6 = vsel %vm594_vm10, %v2963_v43, 0.0  ;;  %v2352_v16 = vld [vmem:[#allocation7 + $0x160] sm:$0xff]   ;;  %v2356_v55 = vld [vmem:[#allocation7 + $0x168] sm:$0xff]  }
 0x145   : > { %vm806_vm12 = vcmp.eq.s32.totalorder %v3564_v32, %v2980_v56  ;;  %v671_v11 = vsel %vm596_vm11, %v2963_v43, 0.0  ;;  %v733_v12 = vadd.f32 %v669_v6, %v521_v10  ;;  %vm808_vm13 = vcmp.eq.s32.totalorder %v328_v60, %v2980_v56  ;;  %v2353_v31 = vld [vmem:[#allocation7 + $0x120] sm:$0xff]   ;;  %v2357_v58 = vld [vmem:[#allocation7 + $0x128] sm:$0xff]   ;;  %v2361_v10 = vld [vmem:[#allocation7 + $0x130] sm:$0xff]  }
 0x146   : > { %v881_v2 = vsel %vm806_vm12, %v2983_v57, 0.0  ;;  %v1195_v36 = vpack.c.bf16 %v1160_v5, %v1158_v13  ;;  %v735_v37 = vadd.f32 %v671_v11, %v523_v14  ;;  %v883_v40 = vsel %vm808_vm13, %v2983_v57, 0.0  ;;  %v2360_v13 = vld [vmem:[#allocation7 + $0x170] sm:$0xff]   ;;  %v2362_v14 = vld [vmem:[#allocation7 + $0xf8] sm:$0xff]  }
 0x147   : > { %vm1018_vm14 = vcmp.eq.s32.totalorder %v3564_v32, %v2986_v62  ;;  %v945_v41 = vadd.f32 %v881_v2, %v733_v12  ;;  %vm1020_vm15 = vcmp.eq.s32.totalorder %v328_v60, %v2986_v62  ;;  %v329_v51 = vadd.s32 240, %v2804_v1  ;;  %v2363_v5 = vld [vmem:[#allocation7 + $0xb8] sm:$0xff]   ;;  %2176 = vmatprep.subr.bf16.mxu1 %v2362_v14  ;;  %v2366_v12 = vld [vmem:[#allocation7 + $0x40] sm:$0xff]  }
 0x148   : > { %v1093_v3 = vsel %vm1018_vm14, %v2989_v7, 0.0  ;;  %1237 = vmatprep.subr.bf16.mxu0 %v1195_v36  ;;  %v947_v54 = vadd.f32 %v883_v40, %v735_v37  ;;  %v1095_v44 = vsel %vm1020_vm15, %v2989_v7, 0.0  ;;  %v330_v45 = vadd.s32 248, %v2804_v1  ;;  %v2364_v6 = vld [vmem:[#allocation7 + $0x178] sm:$0xff]   ;;  %2177 = vmatpush3.bf16.msra.mxu1 %v2363_v5 }
 0x149   : > { %v1206_v46 = vcombine.high %v3634_v35, %v3634_v35  ;;  %v1157_v47 = vadd.f32 %v1093_v3, %v945_v41  ;;  %vm451_vm0 = vcmp.eq.s32.totalorder %v329_v51, %v2904_v63  ;;  %vm599_vm1 = vcmp.eq.s32.totalorder %v329_v51, %v2924_v23  ;;  %v2365_v11 = vld [vmem:[#allocation7 + $0x138] sm:$0xff]   ;;  %2184 = vmatprep.subr.bf16.mxu1 %v2366_v12 }
 0x14a   : > { %vm811_vm2 = vcmp.eq.s32.totalorder %v329_v51, %v2929_v26  ;;  %v1159_v32 = vadd.f32 %v1095_v44, %v947_v54  ;;  %vm453_vm3 = vcmp.eq.s32.totalorder %v330_v45, %v2904_v63  ;;  %v526_v48 = vsel %vm451_vm0, %v2907_v0, 0.0  ;;  %v2367_v54 = vld [vmem:[#allocation7] sm:$0xff]  }
 0x14b   : > { %vm601_vm4 = vcmp.eq.s32.totalorder %v330_v45, %v2924_v23  ;;  %1241 = vmatprep.mubr.bf16.mxu0 %v1206_v46  ;;  %v528_v1 = vsel %vm453_vm3, %v2907_v0, 0.0  ;;  %v674_v49 = vsel %vm599_vm1, %v2914_v9, 0.0  ;;  %vm813_vm5 = vcmp.eq.s32.totalorder %v330_v45, %v2929_v26  ;;  %v2368_v46 = vld [vmem:[#allocation7 + $0x48] sm:$0xff]  }
 0x14c   : > { %v676_v50 = vsel %vm601_vm4, %v2914_v9, 0.0  ;;  %v1194_v52 = vpack.c.bf16 %v1159_v32, %v1157_v47  ;;  %v738_v53 = vadd.f32 %v674_v49, %v526_v48  ;;  %v886_v34 = vsel %vm811_vm2, %v2932_v27, 0.0  ;;  %v2369_v47 = vld [vmem:[#allocation7 + $0x8] sm:$0xff]   ;;  %v2370_v32 = vld [vmem:[#allocation7 + $0x50] sm:$0xff]   ;;  %v2373_v49 = vld [vmem:[#allocation7 + $0x18] sm:$0xff]  }
 0x14d   : > { %v740_v33 = vadd.f32 %v676_v50, %v528_v1  ;;  %v888_v63 = vsel %vm813_vm5, %v2932_v27, 0.0  ;;  %vm1023_vm6 = vcmp.eq.s32.totalorder %v329_v51, %v2950_v38  ;;  %vm1025_vm7 = vcmp.eq.s32.totalorder %v330_v45, %v2950_v38  ;;  %v2371_v48 = vld [vmem:[#allocation7 + $0x10] sm:$0xff]   ;;  %v2372_v1 = vld [vmem:[#allocation7 + $0x58] sm:$0xff]   ;;  %v2374_v50 = vld [vmem:[#allocation7 + $0x60] sm:$0xff]  }
 0x14e   : > { %vm450_vm8 = vcmp.eq.s32.totalorder %v329_v51, %v2917_v17  ;;  %1238 = vmatpush1.bf16.msra.mxu0 %v1194_v52  ;;  %v950_v0 = vadd.f32 %v886_v34, %v738_v53  ;;  %v1098_v9 = vsel %vm1023_vm6, %v2939_v29, 0.0  ;;  %v1100_v26 = vsel %vm1025_vm7, %v2939_v29, 0.0  ;;  %v2375_v52 = vld [vmem:[#allocation7 + $0x20] sm:$0xff]   ;;  %v2376_v53 = vld [vmem:[#allocation7 + $0x68] sm:$0xff]   ;;  %v2378_v34 = vld [vmem:[#allocation7 + $0x70] sm:$0xff]  }
 0x14f   : > { %v952_v23 = vadd.f32 %v888_v63, %v740_v33  ;;  %vm452_vm9 = vcmp.eq.s32.totalorder %v330_v45, %v2917_v17  ;;  %v525_v60 = vsel %vm450_vm8, %v2957_v39, 0.0  ;;  %vm598_vm10 = vcmp.eq.s32.totalorder %v329_v51, %v2960_v42  ;;  %v2377_v33 = vld [vmem:[#allocation7 + $0x28] sm:$0xff]   ;;  %v2379_v63 = vld [vmem:[#allocation7 + $0x30] sm:$0xff]  }
 0x150   : > { %vm600_vm11 = vcmp.eq.s32.totalorder %v330_v45, %v2960_v42  ;;  %v1162_v27 = vadd.f32 %v1098_v9, %v950_v0  ;;  %v527_v38 = vsel %vm452_vm9, %v2957_v39, 0.0  ;;  %v673_v21 = vsel %vm598_vm10, %v2963_v43, 0.0  ;;  %v2380_v0 = vld [vmem:[#allocation7 + $0x78] sm:$0xff]   ;;  %v2382_v9 = vld [vmem:[#allocation7 + $0x1c0] sm:$0xff]  }
 0x151   : > { %v1164_v8 = vadd.f32 %v1100_v26, %v952_v23  ;;  %v675_v59 = vsel %vm600_vm11, %v2963_v43, 0.0  ;;  %v737_v61 = vadd.f32 %v673_v21, %v525_v60  ;;  %vm810_vm12 = vcmp.eq.s32.totalorder %v329_v51, %v2980_v56  ;;  %v2381_v23 = vld [vmem:[#allocation7 + $0x38] sm:$0xff]   ;;  %v2383_v26 = vld [vmem:[#allocation7 + $0x180] sm:$0xff]   ;;  %v2384_v60 = vld [vmem:[#allocation7 + $0x1c8] sm:$0xff]  }
 0x152   : > { %vm812_vm13 = vcmp.eq.s32.totalorder %v330_v45, %v2980_v56  ;;  %v739_v29 = vadd.f32 %v675_v59, %v527_v38  ;;  %v885_v4 = vsel %vm810_vm12, %v2983_v57, 0.0  ;;  %vm1022_vm14 = vcmp.eq.s32.totalorder %v329_v51, %v2986_v62  ;;  %v2336_v56 = vld [vmem:[#allocation7 + $0x140] sm:$0xff]   ;;  %v2386_v38 = vld [vmem:[#allocation7 + $0x1d0] sm:$0xff]   ;;  %v2388_v59 = vld [vmem:[#allocation7 + $0x1d8] sm:$0xff]  }
 0x153   : > { %v1197_v17 = vpack.c.bf16 %v1164_v8, %v1162_v27  ;;  %v887_v18 = vsel %vm812_vm13, %v2983_v57, 0.0  ;;  %v949_v42 = vadd.f32 %v885_v4, %v737_v61  ;;  %vm1024_vm15 = vcmp.eq.s32.totalorder %v330_v45, %v2986_v62  ;;  %v2341_v57 = vld [vmem:[#allocation7 + $0x108] sm:$0xff]   ;;  %v2344_v62 = vld [vmem:[#allocation7 + $0x150] sm:$0xff]   ;;  %v2389_v61 = vld [vmem:[#allocation7 + $0x198] sm:$0xff]  }
 0x154   : > { %v951_v39 = vadd.f32 %v887_v18, %v739_v29  ;;  %v1097_v43 = vsel %vm1022_vm14, %v2989_v7, 0.0  ;;  %v1099_v19 = vsel %vm1024_vm15, %v2989_v7, 0.0  ;;  %v2349_v7 = vld [vmem:[#allocation7 + $0x118] sm:$0xff]   ;;  %v2385_v8 = vld [vmem:[#allocation7 + $0x188] sm:$0xff]   ;;  %v2387_v21 = vld [vmem:[#allocation7 + $0x190] sm:$0xff]  }
 0x155   : > { %1239 = vmatprep.subr.bf16.mxu0 %v1197_v17  ;;  %v1161_v22 = vadd.f32 %v1097_v43, %v949_v42  ;;  %v2390_v17 = vld [vmem:[#allocation7 + $0x1e0] sm:$0xff]   ;;  %v2392_v4 = vld [vmem:[#allocation7 + $0x1e8] sm:$0xff]   ;;  %v2394_v42 = vld [vmem:[#allocation7 + $0x1f0] sm:$0xff]  }
 0x156   : > { %v1163_v20 = vadd.f32 %v1099_v19, %v951_v39  ;;  %v2391_v29 = vld [vmem:[#allocation7 + $0x1a0] sm:$0xff]   ;;  %v2393_v18 = vld [vmem:[#allocation7 + $0x1a8] sm:$0xff]   ;;  %v2395_v39 = vld [vmem:[#allocation7 + $0x1b0] sm:$0xff]  }
 0x157   : > { %v2396_v43 = vld [vmem:[#allocation7 + $0x1f8] sm:$0xff]  }
 0x158   : > { %v1196_v24 = vpack.c.bf16 %v1163_v20, %v1161_v22  ;;  %v2397_v19 = vld [vmem:[#allocation7 + $0x1b8] sm:$0xff]   ;;  %v296_v20 = vld [vmem:[%s3754_s3] sm:$0x1] }
 0x159   : > { %297 = vst [vmem:[%s3692_s29] sm:$0x1] %v296_v20 }
 0x15a   : > { %1240 = vmatpush1.bf16.msra.mxu0 %v1196_v24 }
 0x15b   : > { %2206 = vmatprep.subr.bf16.mxu0 %v2336_v56 }
 0x15d   : > { %1242 = vmatmul.mubr.bf16.vlgmr.msra.gmra.mrb[0].mxu0 %v3634_v35 }
 0x15e   : > { %2207 = vmatpush3.bf16.msra.mxu0 %v2337_v25 }
 0x15f   : > { %2208 = vmatprep.subr.bf16.mxu0 %v2340_v28 }
 0x162   : > { %2209 = vmatpush3.bf16.msra.mxu0 %v2341_v57 }
 0x163   : > { %2210 = vmatprep.subr.bf16.mxu0 %v2344_v62 }
 0x166   : > { %2211 = vmatpush3.bf16.msra.mxu0 %v2345_v30 }
 0x167   : > { %2212 = vmatprep.subr.bf16.mxu0 %v2348_v15 }
 0x16a   : > { %2213 = vmatpush3.bf16.msra.mxu0 %v2349_v7 }
 0x16b   : > { %2214 = vmatprep.subr.bf16.mxu0 %v2352_v16 }
 0x16e   : > { %2215 = vmatpush3.bf16.msra.mxu0 %v2353_v31 }
 0x16f   : > { %2216 = vmatprep.subr.bf16.mxu0 %v2356_v55 }
 0x172   : > { %2217 = vmatpush3.bf16.msra.mxu0 %v2357_v58 }
 0x173   : > { %2218 = vmatprep.subr.bf16.mxu0 %v2360_v13 }
 0x176   : > { %2219 = vmatpush3.bf16.msra.mxu0 %v2361_v10 }
 0x177   : > { %2220 = vmatprep.subr.bf16.mxu0 %v2364_v6 }
 0x17a   : > { %2221 = vmatpush3.bf16.msra.mxu0 %v2365_v11 }
 0x230   : > { %v1243_v2 = vpop.f32.mrb[0].mxu0 }
 0x231   : > { %v3679_v35 = vpack.c.bf16 %v1243_v2, %v1243_v2  ;;  %v1245_v36 = vpop.f32.mrb[1].mxu0 }
 0x232   : > { %v1251_v37 = vpack.c.bf16 %v1245_v36, %v1245_v36  ;;  %v1247_v40 = vpop.f32.mrb[2].mxu0 }
 0x233   : > { %v1248_v41 = vpop.f32.mrb[3].mxu0  ;;  %v1632_v44 = vrot.slane %v3679_v35, 1  ;;  %v1318_v45 = vshrl.u32 %v3679_v35, 16 }
 0x234   : > { %v1321_v3 = vshrl.u32 %v1251_v37, 16  ;;  %v1633_v51 = vrot.slane %v1251_v37, 1 }
 0x235   : > { %v1806_v22 = vrot.slane %v1318_v45, 1 }
 0x236   : > { %1453 = vmatprep.mubr.bf16.mxu1 %v1321_v3  ;;  %1764 = vmatprep.mubr.bf16.mxu0 %v1633_v51  ;;  %v1807_v27 = vrot.slane %v1321_v3, 1 }
 0x237   : > { %1454 = vmatmul.mubr.bf16.vlgmr.msra.gmra.mrb[0].mxu1 %v1318_v45  ;;  %1765 = vmatmul.mubr.bf16.vlgmr.msra.gmra.mrb[4].mxu0 %v1632_v44 }
 0x238   : > { %2185 = vmatpush3.bf16.msra.mxu1 %v2367_v54  ;;  %1589 = vmatprep.mubr.bf16.mxu1 %v1251_v37 }
 0x239   : > { %2186 = vmatprep.subr.bf16.mxu1 %v2368_v46 }
 0x23c   : > { %2187 = vmatpush3.bf16.msra.mxu1 %v2369_v47 }
 0x23d   : > { %2188 = vmatprep.subr.bf16.mxu1 %v2370_v32 }
 0x240   : > { %2189 = vmatpush3.bf16.msra.mxu1 %v2371_v48 }
 0x241   : > { %2190 = vmatprep.subr.bf16.mxu1 %v2372_v1 }
 0x244   : > { %2191 = vmatpush3.bf16.msra.mxu1 %v2373_v49 }
 0x245   : > { %2192 = vmatprep.subr.bf16.mxu1 %v2374_v50 }
 0x248   : > { %2193 = vmatpush3.bf16.msra.mxu1 %v2375_v52 }
 0x249   : > { %2194 = vmatprep.subr.bf16.mxu1 %v2376_v53 }
 0x24c   : > { %2195 = vmatpush3.bf16.msra.mxu1 %v2377_v33 }
 0x24d   : > { %2196 = vmatprep.subr.bf16.mxu1 %v2378_v34 }
 0x250   : > { %2197 = vmatpush3.bf16.msra.mxu1 %v2379_v63 }
 0x251   : > { %2198 = vmatprep.subr.bf16.mxu1 %v2380_v0 }
 0x254   : > { %2199 = vmatpush3.bf16.msra.mxu1 %v2381_v23 }
 0x255   : > { %2228 = vmatprep.subr.bf16.mxu1 %v2382_v9 }
 0x257   : > { %1590 = vmatmul.mubr.bf16.vlgmr.msra.gmra.mrb[4].mxu1 %v3679_v35  ;;  %v1947_v35 = vld [vmem:[%s3692_s29] sm:$0x1] }
 0x258   : > { %2229 = vmatpush3.bf16.msra.mxu1 %v2383_v26  ;;  %1938 = vmatprep.mubr.bf16.mxu1 %v1807_v27 }
 0x259   : > { %2230 = vmatprep.subr.bf16.mxu1 %v2384_v60 }
 0x25c   : > { %2231 = vmatpush3.bf16.msra.mxu1 %v2385_v8 }
 0x25d   : > { %2232 = vmatprep.subr.bf16.mxu1 %v2386_v38 }
 0x260   : > { %2233 = vmatpush3.bf16.msra.mxu1 %v2387_v21 }
 0x261   : > { %2234 = vmatprep.subr.bf16.mxu1 %v2388_v59 }
 0x264   : > { %2235 = vmatpush3.bf16.msra.mxu1 %v2389_v61 }
 0x265   : > { %2236 = vmatprep.subr.bf16.mxu1 %v2390_v17 }
 0x268   : > { %2237 = vmatpush3.bf16.msra.mxu1 %v2391_v29 }
 0x269   : > { %2238 = vmatprep.subr.bf16.mxu1 %v2392_v4 }
 0x26c   : > { %2239 = vmatpush3.bf16.msra.mxu1 %v2393_v18 }
 0x26d   : > { %2240 = vmatprep.subr.bf16.mxu1 %v2394_v42 }
 0x270   : > { %2241 = vmatpush3.bf16.msra.mxu1 %v2395_v39 }
 0x271   : > { %2242 = vmatprep.subr.bf16.mxu1 %v2396_v43 }
 0x274   : > { %2243 = vmatpush3.bf16.msra.mxu1 %v2397_v19 }
 0x277   : > { %1939 = vmatmul.mubr.bf16.vlgmr.msra.gmra.mrb[8].mxu1 %v1806_v22 }
 0x30a   : > { %v2178_v56 = vpop.f32.mrb[0].mxu1  ;;  %v2222_v24 = vpop.f32.mrb[4].mxu0 }
 0x30b   : > { %v2179_v25 = vpop.f32.mrb[1].mxu1  ;;  %v2223_v28 = vpop.f32.mrb[5].mxu0 }
 0x30c   : > { %v2180_v57 = vadd.f32 %v2179_v25, %v2178_v56  ;;  %v2224_v62 = vadd.f32 %v2223_v28, %v2222_v24  ;;  %v2181_v30 = vpop.f32.mrb[2].mxu1  ;;  %v2225_v15 = vpop.f32.mrb[6].mxu0 }
 0x30d   : > { %v2182_v7 = vpop.f32.mrb[3].mxu1  ;;  %v2226_v16 = vpop.f32.mrb[7].mxu0 }
 0x32a   : > { %v2200_v31 = vpop.f32.mrb[4].mxu1 }
 0x32b   : > { %v2201_v55 = vpop.f32.mrb[5].mxu1 }
 0x32c   : > { %v2202_v58 = vadd.f32 %v2201_v55, %v2200_v31  ;;  %v2203_v13 = vpop.f32.mrb[6].mxu1 }
 0x32d   : > { %v2204_v10 = vpop.f32.mrb[7].mxu1 }
 0x32e   : > { %v1592_v14 = vadd.f32 %v2202_v58, %v2180_v57 }
 0x330   : > { %v1772_v5 = vadd.f32 %v2224_v62, %v1592_v14 }
 0x34a   : > { %v2244_v6 = vpop.f32.mrb[8].mxu1 }
 0x34b   : > { %v2245_v11 = vpop.f32.mrb[9].mxu1 }
 0x34c   : > { %v2246_v12 = vadd.f32 %v2245_v11, %v2244_v6  ;;  %v2247_v2 = vpop.f32.mrb[10].mxu1 }
 0x34d   : > { %v2248_v36 = vpop.f32.mrb[11].mxu1 }
 0x34e   : > { %v1946_v37 = vadd.f32 %v2246_v12, %v1772_v5 }
 0x350   : > { %v1948_v40 = vadd.f32 %v1947_v35, %v1946_v37 }
 0x352   : > { %1949 = vst [vmem:[%s3692_s29] sm:$0x1] %v1948_v40 }
 0x353   : > { %2499 = shalt.err (!%p2496_p4)
}
 0x354   : > { %s2500_s10 = scalar_lea.hbm %s3701_s19, 16  ;;  %s2504_s22 = scalar_lea.hbm %s3755_s4, 32 }
 0x355   : > { %p2501_p8 = scmp.ne.s32.totalorder %s3701_s19, %s2500_s10  ;;  %p2505_p3 = scmp.lt.u32.totalorder %s3701_s19, %s3755_s4 }
 0x356   : > { %p2506_p10 = scmp.lt.u32.totalorder %s2504_s22, %s2500_s10  ;;  %p2508_p12 = scmp.lt.u32.totalorder %s2500_s10, %s3701_s19 }
 0x357   : > { %p2502_p11 = pnand %p2501_p8, %p3786_p0 }
 0x358   : > { %p2507_p13 = por %p2506_p10, %p2505_p3 }
 0x359   : > { %p2503_p6 = pneg %p2502_p11 }
 0x35a   : > { %p2509_p5 = por %p2508_p12, %p2507_p13 }
 0x35c   : > { %p2510_p9 = pnand %p2509_p5, %p2503_p6 }
 0x35e   : > { %2513 = shalt.err (!%p2510_p9)
}
 0x35f   : > { %2262 = dma.vmem_to_hbm [thread:$0]  (%p3786_p0), %s3703_s27, 16, %s3701_s19, %s1951_s6  }
 0x360 PF: > { %s1975_s25 = sand.u32 1, %s2556_s15   ;;  %p3787_p1 = scmp.ne.s32.totalorder %s3765_s24, 0 }
 0x361   : > { %p3788_p2 = scmp.ge.s32.totalorder %s2576_s20, 2  ;;  %s1976_s21 = scalar_lea.sflag [#allocation4], %s1975_s25 }
 0x363   : > { %p2276_p7 = pnand %p3788_p2, %p3787_p1 }
 0x365   : > { %2551 = dma.done.wait (!%p2276_p7), %s1976_s21, 16  }
 0x366   : > { %2553 = vsyncadd (!%p2276_p7), %s1976_s21, 4294967280  ;;  %s23_s20 = sadd.s32 1, %s2576_s20   ;;  %s3789_s18 = sld [smem:[#allocation13_spill]] }
 0x367   : > { %p20_p4 = scmp.ge.s32.totalorder %s23_s20, 4   ;;  %s3790_s19 = sld [smem:[#allocation14_spill]] }
 0x368   : > { %s3791_s15 = smov %s2560_s16  ;;  %s3792_s16 = smov %s2564_s17 }
 0x369   : > { %s3793_s17 = smov %s2712_s7  ;;  %22 = sbr.rel (!%p20_p4) target bundleno = 10 (0xa), region = 107 }
 0x370   :  { %1980 = vsyncpa [#allocation3], 1 }
 0x371   :  { %1982 = vsyncpa [#allocation3 + $0x1], 1 }
 0x372   :  { %1983 = vsyncpa [#allocation6], 1 }
 0x373   :  { %1985 = vsyncpa [#allocation6 + $0x1], 1 }
 0x374   :  { %1986 = vsyncpa [#allocation4], 1 }
 0x375   :  { %1988 = vsyncpa [#allocation4 + $0x1], 1 }

</bundles_post_ra>
